<compile_context>
chip_gen: v6e
topology: v6e:2x2x1
jax: 0.10.0
libtpu: 0.0.40
codegen_flags: <defaults>
</compile_context>

<pallas_src>
import math

import jax
import jax.numpy as jnp
from jax import lax
from jax.experimental import pallas as pl
from jax.experimental.pallas import tpu as pltpu

EPS = 1e-5               # nn.LayerNorm default eps (weight=1, bias=0: created in forward)
_SCAN_UNROLL_MAX = 32    # fully unroll the selective scan for short static sequences


def _layer_norm(v):
    m = jnp.mean(v, axis=-1, keepdims=True)
    c = v - m
    var = jnp.mean(c * c, axis=-1, keepdims=True)
    return c * lax.rsqrt(var + EPS)


def _silu(v):
    return v / (1.0 + jnp.exp(-v))


def _softplus(v):
    return jnp.maximum(v, 0.0) + jnp.log(1.0 + jnp.exp(-jnp.abs(v)))


# -----------------------------------------------------------------------------
# Fused kernel: LayerNorm -> Mamba (in_proj, causal depthwise conv, selective
# scan, gating, out_proj) -> residual -> LayerNorm -> DFT -> complex spectral
# weight -> complex SiLU (real/imag decomposition) -> inverse DFT (real part)
# -> residual.  One batch element per grid step.
# -----------------------------------------------------------------------------
def simba_fused_kernel(x_ref, winx_ref, winr_ref, wct_ref, bc_ref,
                       wxd_ref, wxb_ref, wxc_ref, wdt_ref, bdt_ref,
                       alogt_ref, dskip_ref, wout_ref,
                       fr_ref, fi_ref, wr_ref, wi_ref,
                       o_ref,
                       pad_ref, dlt_ref, du_ref, bt_ref, ct_ref, ys_ref):
    f32 = jnp.float32
    x = x_ref[0]                                   # (S, D)
    S = x.shape[0]
    d_in = winx_ref.shape[1]
    n = alogt_ref.shape[0]
    K = wct_ref.shape[0]

    # ---- LayerNorm 1 ----
    normed = _layer_norm(x)

    # ---- Mamba in_proj (bias=False), split into x / res halves ----
    xm = jnp.dot(normed, winx_ref[...], preferred_element_type=f32)     # (S, d_in)
    res = jnp.dot(normed, winr_ref[...], preferred_element_type=f32)    # (S, d_in)

    # ---- depthwise causal Conv1d (kernel K, left pad K-1): left-padded VMEM
    #      scratch + static pl.ds slices; pure VPU work, no (S,S) shift matmuls.
    if K > 1:
        pad_ref[pl.ds(0, K - 1), :] = jnp.zeros((K - 1, d_in), f32)
    pad_ref[pl.ds(K - 1, S), :] = xm
    conv = jnp.zeros((S, d_in), f32) + bc_ref[...]
    for k in range(K):
        conv = conv + pad_ref[pl.ds(k, S), :] * wct_ref[pl.ds(k, 1), :]
    u = _silu(conv)                                                     # (S, d_in)

    # ---- SSM input-dependent parameters (x_proj split into delta / B / C) ----
    delta_lr = jnp.dot(u, wxd_ref[...], preferred_element_type=f32)     # (S, dt_rank)
    bmat = jnp.dot(u, wxb_ref[...], preferred_element_type=f32)         # (S, n)
    cmat = jnp.dot(u, wxc_ref[...], preferred_element_type=f32)         # (S, n)
    delta = _softplus(jnp.dot(delta_lr, wdt_ref[...], preferred_element_type=f32)
                      + bdt_ref[...])                                   # (S, d_in)
    a_neg = -jnp.exp(alogt_ref[...])                                    # (n, d_in)

    # ---- stage scan operands once in VMEM scratch; rows read back with pl.ds ----
    dlt_ref[...] = delta
    du_ref[...] = delta * u
    bt_ref[...] = bmat.T                                                # (n, S)
    ct_ref[...] = cmat.T                                                # (n, S)

    def scan_step(i, h):
        d_i = dlt_ref[pl.ds(i, 1), :]               # (1, d_in)
        w_i = du_ref[pl.ds(i, 1), :]                # (1, d_in)
        b_i = bt_ref[:, pl.ds(i, 1)]                # (n, 1)
        c_i = ct_ref[:, pl.ds(i, 1)]                # (n, 1)
        h = jnp.exp(d_i * a_neg) * h + b_i * w_i    # (n, d_in)  VPU/EUP only
        ys_ref[pl.ds(i, 1), :] = jnp.sum(c_i * h, axis=0, keepdims=True)
        return h

    h = jnp.zeros((n, d_in), f32)
    if S <= _SCAN_UNROLL_MAX:
        for i in range(S):                          # fully unrolled, static indices
            h = scan_step(i, h)
    else:
        h = lax.fori_loop(0, S, scan_step, h)       # long-sequence fallback

    # ---- D skip, SiLU gate, out_proj, residual ----
    y = (ys_ref[...] + u * dskip_ref[...]) * _silu(res)
    mamba_out = jnp.dot(y, wout_ref[...], preferred_element_type=f32)   # (S, D)
    out1 = x + mamba_out                            # dropout == identity (eval)

    # ---- LayerNorm 2 + EinFFTText (FFT as DFT matmul, all in-kernel) ----
    normed2 = _layer_norm(out1)
    fr = fr_ref[...]
    fi = fi_ref[...]
    xr = jnp.dot(fr, normed2, preferred_element_type=f32)               # Re(fft)
    xi = jnp.dot(fi, normed2, preferred_element_type=f32)               # Im(fft)
    wr = wr_ref[...]
    wi = wi_ref[...]
    er = xr * wr - xi * wi                          # spectrum * complex weight
    ei = xr * wi + xi * wr
    # complex SiLU: z * sigmoid(z), z = er + i*ei, in real arithmetic.
    #   exp(-z) = exp(-er) * (cos(ei) - i*sin(ei));  1 + exp(-z) = p + i*q
    emag = jnp.exp(-er)
    p = 1.0 + emag * jnp.cos(ei)
    q = -emag * jnp.sin(ei)
    inv_den = 1.0 / (p * p + q * q)
    sr = (er * p + ei * q) * inv_den                # Re(z * sigmoid(z))
    si = (ei * p - er * q) * inv_den                # Im(z * sigmoid(z))
    # Re(ifft(z)) = (Fr @ Re(z) + Fi @ Im(z)) / S   (ifft matrix = conj(F) / S)
    ifft_re = (jnp.dot(fr, sr, preferred_element_type=f32)
               + jnp.dot(fi, si, preferred_element_type=f32)) * (1.0 / S)

    o_ref[0] = out1 + ifft_re


def _const_spec(arr):
    nd = arr.ndim
    return pl.BlockSpec(arr.shape, lambda b, nd=nd: (0,) * nd)


def simba_block_forward(x, p):
    """SimbaBlock forward.  x: (B, S, D) float32, returns (B, S, D) float32."""
    B, S, D = x.shape
    f32 = jnp.float32
    d_in = p["w_in_x"].shape[1]
    n = p["a_log_t"].shape[0]
    K = p["conv_w_t"].shape[0]
    bsd_spec = pl.BlockSpec((1, S, D), lambda b: (b, 0, 0))

    weights = (p["w_in_x"], p["w_in_r"], p["conv_w_t"], p["conv_b"],
               p["wx_d"], p["wx_b"], p["wx_c"], p["wdt_t"], p["dt_b"],
               p["a_log_t"], p["d_skip"], p["w_out_t"],
               p["fr"], p["fi"], p["einfft_wr"], p["einfft_wi"])

    scratch = [
        pltpu.VMEM((S + K - 1, d_in), f32),   # left-padded conv buffer
        pltpu.VMEM((S, d_in), f32),           # delta
        pltpu.VMEM((S, d_in), f32),           # delta * u
        pltpu.VMEM((n, S), f32),              # B^T (column per timestep)
        pltpu.VMEM((n, S), f32),              # C^T (column per timestep)
        pltpu.VMEM((S, d_in), f32),           # scan outputs y
    ]

    return pl.pallas_call(
        simba_fused_kernel,
        out_shape=jax.ShapeDtypeStruct((B, S, D), f32),
        grid=(B,),
        in_specs=[bsd_spec] + [_const_spec(w) for w in weights],
        out_specs=bsd_spec,
        scratch_shapes=scratch,
        compiler_params=pltpu.CompilerParams(
            dimension_semantics=("parallel",)),   # batch elems independent -> 2 TCs on v7x
    )(x, *weights)


def init_params(key, dim, d_state, d_conv, seq_len):
    """Deterministic synthetic parameters matching the module's parameter shapes."""
    d_in = 2 * dim                          # expand = 2 (zeta MambaBlock default)
    dt_rank = max(1, math.ceil(dim / 16))   # zeta MambaBlock: ceil(dim / 16)
    n = d_state
    K = d_conv
    keys = jax.random.split(key, 12)

    def linw(k, fan_in, shape):
        lim = 1.0 / math.sqrt(fan_in)
        return jax.random.uniform(k, shape, jnp.float32, -lim, lim)

    p = {
        # in_proj (bias=False) split into x / res halves, stored transposed (D, d_in).
        "w_in_x": linw(keys[0], dim, (dim, d_in)),
        "w_in_r": linw(keys[1], dim, (dim, d_in)),
        # depthwise Conv1d weight (d_in, 1, K) stored as (K, d_in); bias as (1, d_in).
        "conv_w_t": linw(keys[2], K, (K, d_in)),
        "conv_b": linw(keys[3], K, (1, d_in)),
        # x_proj (bias=False) split into delta / B / C column blocks, transposed.
        "wx_d": linw(keys[4], d_in, (d_in, dt_rank)),
        "wx_b": linw(keys[5], d_in, (d_in, n)),
        "wx_c": linw(keys[6], d_in, (d_in, n)),
        # dt_proj (with bias), stored transposed.
        "wdt_t": linw(keys[7], dt_rank, (dt_rank, d_in)),
        "dt_b": linw(keys[8], dt_rank, (1, d_in)),
        # A_log = log(repeat(arange(1..n), d_in)) stored transposed (n, d_in); D = ones.
        "a_log_t": jnp.log(jnp.broadcast_to(
            jnp.arange(1, n + 1, dtype=jnp.float32)[:, None], (n, d_in))),
        "d_skip": jnp.ones((1, d_in), jnp.float32),
        # out_proj (bias=False), stored transposed (d_in, D).
        "w_out_t": linw(keys[9], d_in, (d_in, dim)),
        # EinFFTText complex spectral weight (sequence_length, dim), small init.
        "einfft_wr": 0.02 * jax.random.normal(keys[10], (seq_len, dim), jnp.float32),
        "einfft_wi": 0.02 * jax.random.normal(keys[11], (seq_len, dim), jnp.float32),
    }
    # DFT matrices for FFT-as-matmul along the sequence axis.
    idx = jnp.arange(seq_len, dtype=jnp.float32)
    theta = 2.0 * jnp.pi * idx[:, None] * idx[None, :] / seq_len
    p["fr"] = jnp.cos(theta)
    p["fi"] = -jnp.sin(theta)
    return p


def simba_reference(x, p):
    """Pure-JAX reference of the same forward pass (for correctness checking)."""
    B, S, D = x.shape
    K = p["conv_w_t"].shape[0]
    n = p["wx_b"].shape[1]
    d_in = p["w_in_x"].shape[1]

    normed = _layer_norm(x)
    xm = normed @ p["w_in_x"]
    res = normed @ p["w_in_r"]

    padded = jnp.pad(xm, ((0, 0), (K - 1, 0), (0, 0)))
    conv = jnp.broadcast_to(p["conv_b"][None], (B, S, d_in))
    for k in range(K):
        conv = conv + padded[:, k:k + S, :] * p["conv_w_t"][k][None, None, :]
    u = _silu(conv)

    delta = _softplus((u @ p["wx_d"]) @ p["wdt_t"] + p["dt_b"][None])
    bmat = u @ p["wx_b"]
    cmat = u @ p["wx_c"]
    a_neg = -jnp.exp(p["a_log_t"])                                   # (n, d_in)

    def step(h, inp):
        d_t, u_t, b_t, c_t = inp
        da = jnp.exp(d_t[:, None, :] * a_neg[None])                  # (B, n, d_in)
        dbu = b_t[:, :, None] * (d_t * u_t)[:, None, :]
        h = da * h + dbu
        y = jnp.einsum("bn,bnd->bd", c_t, h)
        return h, y

    h0 = jnp.zeros((B, n, d_in), jnp.float32)
    inputs = (jnp.moveaxis(delta, 1, 0), jnp.moveaxis(u, 1, 0),
              jnp.moveaxis(bmat, 1, 0), jnp.moveaxis(cmat, 1, 0))
    _, ys = lax.scan(step, h0, inputs)
    ys = jnp.moveaxis(ys, 0, 1)

    y = ys + u * p["d_skip"][None]
    y = y * _silu(res)
    mamba_out = y @ p["w_out_t"]
    out1 = x + mamba_out                                             # dropout == identity

    normed2 = _layer_norm(out1)
    xf = jnp.fft.fft(normed2, axis=1)
    w = (p["einfft_wr"] + 1j * p["einfft_wi"])[None]
    e = xf * w
    act = e / (1.0 + jnp.exp(-e))                                    # SiLU on complex
    fasted = jnp.fft.ifft(act, axis=1)
    out = out1 + fasted
    return jnp.real(out).astype(jnp.float32)


if __name__ == "__main__":
    # SimbaBlock(dim=32, d_state=8, d_conv=4, num_classes=8) on input (B, S, D)
    # with S == num_classes so the EinFFTText spectral weight broadcasts.
    B, S, D = 2, 8, 32
    D_STATE, D_CONV = 8, 4

    key = jax.random.PRNGKey(0)
    kx, kp = jax.random.split(key)
    x = jax.random.normal(kx, (B, S, D), jnp.float32)
    params = init_params(kp, D, D_STATE, D_CONV, S)

    out = jax.block_until_ready(simba_block_forward(x, params))
    ref = jax.block_until_ready(simba_reference(x, params))

    assert out.shape == (B, S, D) and out.dtype == jnp.float32
    assert bool(jnp.all(jnp.isfinite(out)))
    max_err = float(jnp.max(jnp.abs(out - ref)))
    assert max_err < 1e-3, f"kernel/reference mismatch: {max_err}"
    print("KERNEL_OK")
</pallas_src>

<mosaic_0001>
module attributes {stable_mosaic.version = 11 : i64} {
  func.func @simba_fused_kernel(%arg0: i32, %arg1: memref<1x8x32xf32, #tpu.memory_space<vmem>>, %arg2: memref<32x64xf32, #tpu.memory_space<vmem>>, %arg3: memref<32x64xf32, #tpu.memory_space<vmem>>, %arg4: memref<4x64xf32, #tpu.memory_space<vmem>>, %arg5: memref<1x64xf32, #tpu.memory_space<vmem>>, %arg6: memref<64x2xf32, #tpu.memory_space<vmem>>, %arg7: memref<64x8xf32, #tpu.memory_space<vmem>>, %arg8: memref<64x8xf32, #tpu.memory_space<vmem>>, %arg9: memref<2x64xf32, #tpu.memory_space<vmem>>, %arg10: memref<1x64xf32, #tpu.memory_space<vmem>>, %arg11: memref<8x64xf32, #tpu.memory_space<vmem>>, %arg12: memref<1x64xf32, #tpu.memory_space<vmem>>, %arg13: memref<64x32xf32, #tpu.memory_space<vmem>>, %arg14: memref<8x8xf32, #tpu.memory_space<vmem>>, %arg15: memref<8x8xf32, #tpu.memory_space<vmem>>, %arg16: memref<8x32xf32, #tpu.memory_space<vmem>>, %arg17: memref<8x32xf32, #tpu.memory_space<vmem>>, %arg18: memref<1x8x32xf32, #tpu.memory_space<vmem>>, %arg19: memref<11x64xf32, #tpu.memory_space<vmem>>, %arg20: memref<8x64xf32, #tpu.memory_space<vmem>>, %arg21: memref<8x64xf32, #tpu.memory_space<vmem>>, %arg22: memref<8x8xf32, #tpu.memory_space<vmem>>, %arg23: memref<8x8xf32, #tpu.memory_space<vmem>>, %arg24: memref<8x64xf32, #tpu.memory_space<vmem>>) attributes {dimension_semantics = [#tpu.dimension_semantics<parallel>], iteration_bounds = array<i64: 2>, scalar_prefetch = 0 : i64, scratch_operands = 6 : i64, tpu.core_type = #tpu.core_type<tc>, window_params = [{transform_indices = @transform_0, window_bounds = array<i64: 1, 8, 32>}, {pipeline_mode = #tpu.pipeline_mode<synchronous>, transform_indices = @transform_1, window_bounds = array<i64: 32, 64>}, {pipeline_mode = #tpu.pipeline_mode<synchronous>, transform_indices = @transform_2, window_bounds = array<i64: 32, 64>}, {pipeline_mode = #tpu.pipeline_mode<synchronous>, transform_indices = @transform_3, window_bounds = array<i64: 4, 64>}, {pipeline_mode = #tpu.pipeline_mode<synchronous>, transform_indices = @transform_4, window_bounds = array<i64: 1, 64>}, {pipeline_mode = #tpu.pipeline_mode<synchronous>, transform_indices = @transform_5, window_bounds = array<i64: 64, 2>}, {pipeline_mode = #tpu.pipeline_mode<synchronous>, transform_indices = @transform_6, window_bounds = array<i64: 64, 8>}, {pipeline_mode = #tpu.pipeline_mode<synchronous>, transform_indices = @transform_7, window_bounds = array<i64: 64, 8>}, {pipeline_mode = #tpu.pipeline_mode<synchronous>, transform_indices = @transform_8, window_bounds = array<i64: 2, 64>}, {pipeline_mode = #tpu.pipeline_mode<synchronous>, transform_indices = @transform_9, window_bounds = array<i64: 1, 64>}, {pipeline_mode = #tpu.pipeline_mode<synchronous>, transform_indices = @transform_10, window_bounds = array<i64: 8, 64>}, {pipeline_mode = #tpu.pipeline_mode<synchronous>, transform_indices = @transform_11, window_bounds = array<i64: 1, 64>}, {pipeline_mode = #tpu.pipeline_mode<synchronous>, transform_indices = @transform_12, window_bounds = array<i64: 64, 32>}, {pipeline_mode = #tpu.pipeline_mode<synchronous>, transform_indices = @transform_13, window_bounds = array<i64: 8, 8>}, {pipeline_mode = #tpu.pipeline_mode<synchronous>, transform_indices = @transform_14, window_bounds = array<i64: 8, 8>}, {pipeline_mode = #tpu.pipeline_mode<synchronous>, transform_indices = @transform_15, window_bounds = array<i64: 8, 32>}, {pipeline_mode = #tpu.pipeline_mode<synchronous>, transform_indices = @transform_16, window_bounds = array<i64: 8, 32>}, {transform_indices = @transform_17, window_bounds = array<i64: 1, 8, 32>}]} {
    %c0 = arith.constant 0 : index
    %c0_0 = arith.constant 0 : index
    %c0_1 = arith.constant 0 : index
    %0 = vector.load %arg1[%c0, %c0_0, %c0_1] : memref<1x8x32xf32, #tpu.memory_space<vmem>>, vector<1x8x32xf32>
    %1 = vector.shape_cast %0 : vector<1x8x32xf32> to vector<8x32xf32>
    %cst = arith.constant dense<0.000000e+00> : vector<8xf32>
    %2 = vector.multi_reduction <add>, %1, %cst [1] : vector<8x32xf32> to vector<8xf32>
    %3 = vector.shape_cast %2 : vector<8xf32> to vector<8x1xf32>
    %cst_2 = arith.constant 3.200000e+01 : f32
    %4 = vector.broadcast %cst_2 : f32 to vector<8x1xf32>
    %5 = arith.divf %3, %4 : vector<8x1xf32>
    %6 = vector.broadcast %5 : vector<8x1xf32> to vector<8x32xf32>
    %7 = arith.subf %1, %6 : vector<8x32xf32>
    %8 = arith.mulf %7, %7 : vector<8x32xf32>
    %cst_3 = arith.constant dense<0.000000e+00> : vector<8xf32>
    %9 = vector.multi_reduction <add>, %8, %cst_3 [1] : vector<8x32xf32> to vector<8xf32>
    %10 = vector.shape_cast %9 : vector<8xf32> to vector<8x1xf32>
    %cst_4 = arith.constant 3.200000e+01 : f32
    %11 = vector.broadcast %cst_4 : f32 to vector<8x1xf32>
    %12 = arith.divf %10, %11 : vector<8x1xf32>
    %cst_5 = arith.constant 9.99999974E-6 : f32
    %13 = vector.broadcast %cst_5 : f32 to vector<8x1xf32>
    %14 = arith.addf %12, %13 : vector<8x1xf32>
    %15 = math.rsqrt %14 : vector<8x1xf32>
    %16 = vector.broadcast %15 : vector<8x1xf32> to vector<8x32xf32>
    %17 = arith.mulf %7, %16 : vector<8x32xf32>
    %c0_6 = arith.constant 0 : index
    %c0_7 = arith.constant 0 : index
    %18 = vector.load %arg2[%c0_6, %c0_7] : memref<32x64xf32, #tpu.memory_space<vmem>>, vector<32x64xf32>
    %cst_8 = arith.constant dense<0.000000e+00> : vector<8x64xf32>
    %19 = tpu.matmul %17, %18, %cst_8 {dimension_numbers = #tpu.dot_dimension_numbers<[1], [0], [0], [1], [0, 0, 1, 1], [], []>} : vector<8x32xf32>, vector<32x64xf32>, vector<8x64xf32> -> vector<8x64xf32>
    %c0_9 = arith.constant 0 : index
    %c0_10 = arith.constant 0 : index
    %20 = vector.load %arg3[%c0_9, %c0_10] : memref<32x64xf32, #tpu.memory_space<vmem>>, vector<32x64xf32>
    %cst_11 = arith.constant dense<0.000000e+00> : vector<8x64xf32>
    %21 = tpu.matmul %17, %20, %cst_11 {dimension_numbers = #tpu.dot_dimension_numbers<[1], [0], [0], [1], [0, 0, 1, 1], [], []>} : vector<8x32xf32>, vector<32x64xf32>, vector<8x64xf32> -> vector<8x64xf32>
    %cst_12 = arith.constant 0.000000e+00 : f32
    %22 = vector.broadcast %cst_12 : f32 to vector<3x64xf32>
    %c0_13 = arith.constant 0 : index
    %c0_14 = arith.constant 0 : index
    %23 = vector.load %arg19[%c0_13, %c0_14] : memref<11x64xf32, #tpu.memory_space<vmem>>, vector<3x64xf32>
    tpu.vector_store %arg19[%c0_13, %c0_14], %22 {strides = array<i32>} : memref<11x64xf32, #tpu.memory_space<vmem>>, vector<3x64xf32>,
    %c3 = arith.constant 3 : index
    %c0_15 = arith.constant 0 : index
    %24 = vector.load %arg19[%c3, %c0_15] : memref<11x64xf32, #tpu.memory_space<vmem>>, vector<8x64xf32>
    tpu.vector_store %arg19[%c3, %c0_15], %19 {strides = array<i32>} : memref<11x64xf32, #tpu.memory_space<vmem>>, vector<8x64xf32>,
    %cst_16 = arith.constant 0.000000e+00 : f32
    %25 = vector.broadcast %cst_16 : f32 to vector<8x64xf32>
    %c0_17 = arith.constant 0 : index
    %c0_18 = arith.constant 0 : index
    %26 = vector.load %arg5[%c0_17, %c0_18] : memref<1x64xf32, #tpu.memory_space<vmem>>, vector<1x64xf32>
    %27 = vector.broadcast %26 : vector<1x64xf32> to vector<8x64xf32>
    %28 = arith.addf %25, %27 : vector<8x64xf32>
    %c0_19 = arith.constant 0 : index
    %c0_20 = arith.constant 0 : index
    %29 = vector.load %arg19[%c0_19, %c0_20] : memref<11x64xf32, #tpu.memory_space<vmem>>, vector<8x64xf32>
    %c0_21 = arith.constant 0 : index
    %c0_22 = arith.constant 0 : index
    %30 = vector.load %arg4[%c0_21, %c0_22] : memref<4x64xf32, #tpu.memory_space<vmem>>, vector<1x64xf32>
    %31 = vector.broadcast %30 : vector<1x64xf32> to vector<8x64xf32>
    %32 = arith.mulf %29, %31 : vector<8x64xf32>
    %33 = arith.addf %28, %32 : vector<8x64xf32>
    %c1 = arith.constant 1 : index
    %c0_23 = arith.constant 0 : index
    %34 = vector.load %arg19[%c1, %c0_23] : memref<11x64xf32, #tpu.memory_space<vmem>>, vector<8x64xf32>
    %c1_24 = arith.constant 1 : index
    %c0_25 = arith.constant 0 : index
    %35 = vector.load %arg4[%c1_24, %c0_25] : memref<4x64xf32, #tpu.memory_space<vmem>>, vector<1x64xf32>
    %36 = vector.broadcast %35 : vector<1x64xf32> to vector<8x64xf32>
    %37 = arith.mulf %34, %36 : vector<8x64xf32>
    %38 = arith.addf %33, %37 : vector<8x64xf32>
    %c2 = arith.constant 2 : index
    %c0_26 = arith.constant 0 : index
    %39 = vector.load %arg19[%c2, %c0_26] : memref<11x64xf32, #tpu.memory_space<vmem>>, vector<8x64xf32>
    %c2_27 = arith.constant 2 : index
    %c0_28 = arith.constant 0 : index
    %40 = vector.load %arg4[%c2_27, %c0_28] : memref<4x64xf32, #tpu.memory_space<vmem>>, vector<1x64xf32>
    %41 = vector.broadcast %40 : vector<1x64xf32> to vector<8x64xf32>
    %42 = arith.mulf %39, %41 : vector<8x64xf32>
    %43 = arith.addf %38, %42 : vector<8x64xf32>
    %c3_29 = arith.constant 3 : index
    %c0_30 = arith.constant 0 : index
    %44 = vector.load %arg19[%c3_29, %c0_30] : memref<11x64xf32, #tpu.memory_space<vmem>>, vector<8x64xf32>
    %c3_31 = arith.constant 3 : index
    %c0_32 = arith.constant 0 : index
    %45 = vector.load %arg4[%c3_31, %c0_32] : memref<4x64xf32, #tpu.memory_space<vmem>>, vector<1x64xf32>
    %46 = vector.broadcast %45 : vector<1x64xf32> to vector<8x64xf32>
    %47 = arith.mulf %44, %46 : vector<8x64xf32>
    %48 = arith.addf %43, %47 : vector<8x64xf32>
    %cst_33 = arith.constant 0.000000e+00 : f32
    %49 = vector.broadcast %cst_33 : f32 to vector<8x64xf32>
    %50 = arith.subf %49, %48 : vector<8x64xf32>
    %51 = math.exp %50 : vector<8x64xf32>
    %cst_34 = arith.constant 1.000000e+00 : f32
    %52 = vector.broadcast %cst_34 : f32 to vector<8x64xf32>
    %53 = arith.addf %52, %51 : vector<8x64xf32>
    %54 = arith.divf %48, %53 : vector<8x64xf32>
    %c0_35 = arith.constant 0 : index
    %c0_36 = arith.constant 0 : index
    %55 = vector.load %arg6[%c0_35, %c0_36] : memref<64x2xf32, #tpu.memory_space<vmem>>, vector<64x2xf32>
    %cst_37 = arith.constant dense<0.000000e+00> : vector<8x2xf32>
    %56 = tpu.matmul %54, %55, %cst_37 {dimension_numbers = #tpu.dot_dimension_numbers<[1], [0], [0], [1], [0, 0, 1, 1], [], []>} : vector<8x64xf32>, vector<64x2xf32>, vector<8x2xf32> -> vector<8x2xf32>
    %c0_38 = arith.constant 0 : index
    %c0_39 = arith.constant 0 : index
    %57 = vector.load %arg7[%c0_38, %c0_39] : memref<64x8xf32, #tpu.memory_space<vmem>>, vector<64x8xf32>
    %cst_40 = arith.constant dense<0.000000e+00> : vector<8x8xf32>
    %58 = tpu.matmul %54, %57, %cst_40 {dimension_numbers = #tpu.dot_dimension_numbers<[1], [0], [0], [1], [0, 0, 1, 1], [], []>} : vector<8x64xf32>, vector<64x8xf32>, vector<8x8xf32> -> vector<8x8xf32>
    %c0_41 = arith.constant 0 : index
    %c0_42 = arith.constant 0 : index
    %59 = vector.load %arg8[%c0_41, %c0_42] : memref<64x8xf32, #tpu.memory_space<vmem>>, vector<64x8xf32>
    %cst_43 = arith.constant dense<0.000000e+00> : vector<8x8xf32>
    %60 = tpu.matmul %54, %59, %cst_43 {dimension_numbers = #tpu.dot_dimension_numbers<[1], [0], [0], [1], [0, 0, 1, 1], [], []>} : vector<8x64xf32>, vector<64x8xf32>, vector<8x8xf32> -> vector<8x8xf32>
    %c0_44 = arith.constant 0 : index
    %c0_45 = arith.constant 0 : index
    %61 = vector.load %arg9[%c0_44, %c0_45] : memref<2x64xf32, #tpu.memory_space<vmem>>, vector<2x64xf32>
    %cst_46 = arith.constant dense<0.000000e+00> : vector<8x64xf32>
    %62 = tpu.matmul %56, %61, %cst_46 {dimension_numbers = #tpu.dot_dimension_numbers<[1], [0], [0], [1], [0, 0, 1, 1], [], []>} : vector<8x2xf32>, vector<2x64xf32>, vector<8x64xf32> -> vector<8x64xf32>
    %c0_47 = arith.constant 0 : index
    %c0_48 = arith.constant 0 : index
    %63 = vector.load %arg10[%c0_47, %c0_48] : memref<1x64xf32, #tpu.memory_space<vmem>>, vector<1x64xf32>
    %64 = vector.broadcast %63 : vector<1x64xf32> to vector<8x64xf32>
    %65 = arith.addf %62, %64 : vector<8x64xf32>
    %cst_49 = arith.constant 0.000000e+00 : f32
    %66 = vector.broadcast %cst_49 : f32 to vector<8x64xf32>
    %67 = arith.maximumf %65, %66 : vector<8x64xf32>
    %68 = math.absf %65 : vector<8x64xf32>
    %cst_50 = arith.constant 0.000000e+00 : f32
    %69 = vector.broadcast %cst_50 : f32 to vector<8x64xf32>
    %70 = arith.subf %69, %68 : vector<8x64xf32>
    %71 = math.exp %70 : vector<8x64xf32>
    %cst_51 = arith.constant 1.000000e+00 : f32
    %72 = vector.broadcast %cst_51 : f32 to vector<8x64xf32>
    %73 = arith.addf %72, %71 : vector<8x64xf32>
    %74 = math.log %73 : vector<8x64xf32>
    %75 = arith.addf %67, %74 : vector<8x64xf32>
    %c0_52 = arith.constant 0 : index
    %c0_53 = arith.constant 0 : index
    %76 = vector.load %arg11[%c0_52, %c0_53] : memref<8x64xf32, #tpu.memory_space<vmem>>, vector<8x64xf32>
    %77 = math.exp %76 : vector<8x64xf32>
    %cst_54 = arith.constant 0.000000e+00 : f32
    %78 = vector.broadcast %cst_54 : f32 to vector<8x64xf32>
    %79 = arith.subf %78, %77 : vector<8x64xf32>
    %c0_55 = arith.constant 0 : index
    %c0_56 = arith.constant 0 : index
    %80 = vector.load %arg20[%c0_55, %c0_56] : memref<8x64xf32, #tpu.memory_space<vmem>>, vector<8x64xf32>
    tpu.vector_store %arg20[%c0_55, %c0_56], %75 {strides = array<i32>} : memref<8x64xf32, #tpu.memory_space<vmem>>, vector<8x64xf32>,
    %81 = arith.mulf %75, %54 : vector<8x64xf32>
    %c0_57 = arith.constant 0 : index
    %c0_58 = arith.constant 0 : index
    %82 = vector.load %arg21[%c0_57, %c0_58] : memref<8x64xf32, #tpu.memory_space<vmem>>, vector<8x64xf32>
    tpu.vector_store %arg21[%c0_57, %c0_58], %81 {strides = array<i32>} : memref<8x64xf32, #tpu.memory_space<vmem>>, vector<8x64xf32>,
    %83 = tpu.transpose %58, [1, 0] : vector<8x8xf32> -> vector<8x8xf32>
    %c0_59 = arith.constant 0 : index
    %c0_60 = arith.constant 0 : index
    %84 = vector.load %arg22[%c0_59, %c0_60] : memref<8x8xf32, #tpu.memory_space<vmem>>, vector<8x8xf32>
    tpu.vector_store %arg22[%c0_59, %c0_60], %83 {strides = array<i32>} : memref<8x8xf32, #tpu.memory_space<vmem>>, vector<8x8xf32>,
    %85 = tpu.transpose %60, [1, 0] : vector<8x8xf32> -> vector<8x8xf32>
    %c0_61 = arith.constant 0 : index
    %c0_62 = arith.constant 0 : index
    %86 = vector.load %arg23[%c0_61, %c0_62] : memref<8x8xf32, #tpu.memory_space<vmem>>, vector<8x8xf32>
    tpu.vector_store %arg23[%c0_61, %c0_62], %85 {strides = array<i32>} : memref<8x8xf32, #tpu.memory_space<vmem>>, vector<8x8xf32>,
    %cst_63 = arith.constant 0.000000e+00 : f32
    %87 = vector.broadcast %cst_63 : f32 to vector<8x64xf32>
    %c0_64 = arith.constant 0 : index
    %c0_65 = arith.constant 0 : index
    %88 = vector.load %arg20[%c0_64, %c0_65] : memref<8x64xf32, #tpu.memory_space<vmem>>, vector<1x64xf32>
    %c0_66 = arith.constant 0 : index
    %c0_67 = arith.constant 0 : index
    %89 = vector.load %arg21[%c0_66, %c0_67] : memref<8x64xf32, #tpu.memory_space<vmem>>, vector<1x64xf32>
    %c0_68 = arith.constant 0 : index
    %c0_69 = arith.constant 0 : index
    %90 = vector.load %arg22[%c0_68, %c0_69] : memref<8x8xf32, #tpu.memory_space<vmem>>, vector<8x1xf32>
    %c0_70 = arith.constant 0 : index
    %c0_71 = arith.constant 0 : index
    %91 = vector.load %arg23[%c0_70, %c0_71] : memref<8x8xf32, #tpu.memory_space<vmem>>, vector<8x1xf32>
    %92 = vector.broadcast %88 : vector<1x64xf32> to vector<8x64xf32>
    %93 = arith.mulf %92, %79 : vector<8x64xf32>
    %94 = math.exp %93 : vector<8x64xf32>
    %95 = arith.mulf %94, %87 : vector<8x64xf32>
    %96 = vector.broadcast %90 : vector<8x1xf32> to vector<8x64xf32>
    %97 = vector.broadcast %89 : vector<1x64xf32> to vector<8x64xf32>
    %98 = arith.mulf %96, %97 : vector<8x64xf32>
    %99 = arith.addf %95, %98 : vector<8x64xf32>
    %100 = vector.broadcast %91 : vector<8x1xf32> to vector<8x64xf32>
    %101 = arith.mulf %100, %99 : vector<8x64xf32>
    %cst_72 = arith.constant dense<0.000000e+00> : vector<64xf32>
    %102 = vector.multi_reduction <add>, %101, %cst_72 [0] : vector<8x64xf32> to vector<64xf32>
    %103 = vector.shape_cast %102 : vector<64xf32> to vector<1x64xf32>
    %c0_73 = arith.constant 0 : index
    %c0_74 = arith.constant 0 : index
    %104 = vector.load %arg24[%c0_73, %c0_74] : memref<8x64xf32, #tpu.memory_space<vmem>>, vector<1x64xf32>
    tpu.vector_store %arg24[%c0_73, %c0_74], %103 {strides = array<i32>} : memref<8x64xf32, #tpu.memory_space<vmem>>, vector<1x64xf32>,
    %c1_75 = arith.constant 1 : index
    %c0_76 = arith.constant 0 : index
    %105 = vector.load %arg20[%c1_75, %c0_76] : memref<8x64xf32, #tpu.memory_space<vmem>>, vector<1x64xf32>
    %c1_77 = arith.constant 1 : index
    %c0_78 = arith.constant 0 : index
    %106 = vector.load %arg21[%c1_77, %c0_78] : memref<8x64xf32, #tpu.memory_space<vmem>>, vector<1x64xf32>
    %c0_79 = arith.constant 0 : index
    %c1_80 = arith.constant 1 : index
    %107 = vector.load %arg22[%c0_79, %c1_80] : memref<8x8xf32, #tpu.memory_space<vmem>>, vector<8x1xf32>
    %c0_81 = arith.constant 0 : index
    %c1_82 = arith.constant 1 : index
    %108 = vector.load %arg23[%c0_81, %c1_82] : memref<8x8xf32, #tpu.memory_space<vmem>>, vector<8x1xf32>
    %109 = vector.broadcast %105 : vector<1x64xf32> to vector<8x64xf32>
    %110 = arith.mulf %109, %79 : vector<8x64xf32>
    %111 = math.exp %110 : vector<8x64xf32>
    %112 = arith.mulf %111, %99 : vector<8x64xf32>
    %113 = vector.broadcast %107 : vector<8x1xf32> to vector<8x64xf32>
    %114 = vector.broadcast %106 : vector<1x64xf32> to vector<8x64xf32>
    %115 = arith.mulf %113, %114 : vector<8x64xf32>
    %116 = arith.addf %112, %115 : vector<8x64xf32>
    %117 = vector.broadcast %108 : vector<8x1xf32> to vector<8x64xf32>
    %118 = arith.mulf %117, %116 : vector<8x64xf32>
    %cst_83 = arith.constant dense<0.000000e+00> : vector<64xf32>
    %119 = vector.multi_reduction <add>, %118, %cst_83 [0] : vector<8x64xf32> to vector<64xf32>
    %120 = vector.shape_cast %119 : vector<64xf32> to vector<1x64xf32>
    %c1_84 = arith.constant 1 : index
    %c0_85 = arith.constant 0 : index
    %121 = vector.load %arg24[%c1_84, %c0_85] : memref<8x64xf32, #tpu.memory_space<vmem>>, vector<1x64xf32>
    tpu.vector_store %arg24[%c1_84, %c0_85], %120 {strides = array<i32>} : memref<8x64xf32, #tpu.memory_space<vmem>>, vector<1x64xf32>,
    %c2_86 = arith.constant 2 : index
    %c0_87 = arith.constant 0 : index
    %122 = vector.load %arg20[%c2_86, %c0_87] : memref<8x64xf32, #tpu.memory_space<vmem>>, vector<1x64xf32>
    %c2_88 = arith.constant 2 : index
    %c0_89 = arith.constant 0 : index
    %123 = vector.load %arg21[%c2_88, %c0_89] : memref<8x64xf32, #tpu.memory_space<vmem>>, vector<1x64xf32>
    %c0_90 = arith.constant 0 : index
    %c2_91 = arith.constant 2 : index
    %124 = vector.load %arg22[%c0_90, %c2_91] : memref<8x8xf32, #tpu.memory_space<vmem>>, vector<8x1xf32>
    %c0_92 = arith.constant 0 : index
    %c2_93 = arith.constant 2 : index
    %125 = vector.load %arg23[%c0_92, %c2_93] : memref<8x8xf32, #tpu.memory_space<vmem>>, vector<8x1xf32>
    %126 = vector.broadcast %122 : vector<1x64xf32> to vector<8x64xf32>
    %127 = arith.mulf %126, %79 : vector<8x64xf32>
    %128 = math.exp %127 : vector<8x64xf32>
    %129 = arith.mulf %128, %116 : vector<8x64xf32>
    %130 = vector.broadcast %124 : vector<8x1xf32> to vector<8x64xf32>
    %131 = vector.broadcast %123 : vector<1x64xf32> to vector<8x64xf32>
    %132 = arith.mulf %130, %131 : vector<8x64xf32>
    %133 = arith.addf %129, %132 : vector<8x64xf32>
    %134 = vector.broadcast %125 : vector<8x1xf32> to vector<8x64xf32>
    %135 = arith.mulf %134, %133 : vector<8x64xf32>
    %cst_94 = arith.constant dense<0.000000e+00> : vector<64xf32>
    %136 = vector.multi_reduction <add>, %135, %cst_94 [0] : vector<8x64xf32> to vector<64xf32>
    %137 = vector.shape_cast %136 : vector<64xf32> to vector<1x64xf32>
    %c2_95 = arith.constant 2 : index
    %c0_96 = arith.constant 0 : index
    %138 = vector.load %arg24[%c2_95, %c0_96] : memref<8x64xf32, #tpu.memory_space<vmem>>, vector<1x64xf32>
    tpu.vector_store %arg24[%c2_95, %c0_96], %137 {strides = array<i32>} : memref<8x64xf32, #tpu.memory_space<vmem>>, vector<1x64xf32>,
    %c3_97 = arith.constant 3 : index
    %c0_98 = arith.constant 0 : index
    %139 = vector.load %arg20[%c3_97, %c0_98] : memref<8x64xf32, #tpu.memory_space<vmem>>, vector<1x64xf32>
    %c3_99 = arith.constant 3 : index
    %c0_100 = arith.constant 0 : index
    %140 = vector.load %arg21[%c3_99, %c0_100] : memref<8x64xf32, #tpu.memory_space<vmem>>, vector<1x64xf32>
    %c0_101 = arith.constant 0 : index
    %c3_102 = arith.constant 3 : index
    %141 = vector.load %arg22[%c0_101, %c3_102] : memref<8x8xf32, #tpu.memory_space<vmem>>, vector<8x1xf32>
    %c0_103 = arith.constant 0 : index
    %c3_104 = arith.constant 3 : index
    %142 = vector.load %arg23[%c0_103, %c3_104] : memref<8x8xf32, #tpu.memory_space<vmem>>, vector<8x1xf32>
    %143 = vector.broadcast %139 : vector<1x64xf32> to vector<8x64xf32>
    %144 = arith.mulf %143, %79 : vector<8x64xf32>
    %145 = math.exp %144 : vector<8x64xf32>
    %146 = arith.mulf %145, %133 : vector<8x64xf32>
    %147 = vector.broadcast %141 : vector<8x1xf32> to vector<8x64xf32>
    %148 = vector.broadcast %140 : vector<1x64xf32> to vector<8x64xf32>
    %149 = arith.mulf %147, %148 : vector<8x64xf32>
    %150 = arith.addf %146, %149 : vector<8x64xf32>
    %151 = vector.broadcast %142 : vector<8x1xf32> to vector<8x64xf32>
    %152 = arith.mulf %151, %150 : vector<8x64xf32>
    %cst_105 = arith.constant dense<0.000000e+00> : vector<64xf32>
    %153 = vector.multi_reduction <add>, %152, %cst_105 [0] : vector<8x64xf32> to vector<64xf32>
    %154 = vector.shape_cast %153 : vector<64xf32> to vector<1x64xf32>
    %c3_106 = arith.constant 3 : index
    %c0_107 = arith.constant 0 : index
    %155 = vector.load %arg24[%c3_106, %c0_107] : memref<8x64xf32, #tpu.memory_space<vmem>>, vector<1x64xf32>
    tpu.vector_store %arg24[%c3_106, %c0_107], %154 {strides = array<i32>} : memref<8x64xf32, #tpu.memory_space<vmem>>, vector<1x64xf32>,
    %c4 = arith.constant 4 : index
    %c0_108 = arith.constant 0 : index
    %156 = vector.load %arg20[%c4, %c0_108] : memref<8x64xf32, #tpu.memory_space<vmem>>, vector<1x64xf32>
    %c4_109 = arith.constant 4 : index
    %c0_110 = arith.constant 0 : index
    %157 = vector.load %arg21[%c4_109, %c0_110] : memref<8x64xf32, #tpu.memory_space<vmem>>, vector<1x64xf32>
    %c0_111 = arith.constant 0 : index
    %c4_112 = arith.constant 4 : index
    %158 = vector.load %arg22[%c0_111, %c4_112] : memref<8x8xf32, #tpu.memory_space<vmem>>, vector<8x1xf32>
    %c0_113 = arith.constant 0 : index
    %c4_114 = arith.constant 4 : index
    %159 = vector.load %arg23[%c0_113, %c4_114] : memref<8x8xf32, #tpu.memory_space<vmem>>, vector<8x1xf32>
    %160 = vector.broadcast %156 : vector<1x64xf32> to vector<8x64xf32>
    %161 = arith.mulf %160, %79 : vector<8x64xf32>
    %162 = math.exp %161 : vector<8x64xf32>
    %163 = arith.mulf %162, %150 : vector<8x64xf32>
    %164 = vector.broadcast %158 : vector<8x1xf32> to vector<8x64xf32>
    %165 = vector.broadcast %157 : vector<1x64xf32> to vector<8x64xf32>
    %166 = arith.mulf %164, %165 : vector<8x64xf32>
    %167 = arith.addf %163, %166 : vector<8x64xf32>
    %168 = vector.broadcast %159 : vector<8x1xf32> to vector<8x64xf32>
    %169 = arith.mulf %168, %167 : vector<8x64xf32>
    %cst_115 = arith.constant dense<0.000000e+00> : vector<64xf32>
    %170 = vector.multi_reduction <add>, %169, %cst_115 [0] : vector<8x64xf32> to vector<64xf32>
    %171 = vector.shape_cast %170 : vector<64xf32> to vector<1x64xf32>
    %c4_116 = arith.constant 4 : index
    %c0_117 = arith.constant 0 : index
    %172 = vector.load %arg24[%c4_116, %c0_117] : memref<8x64xf32, #tpu.memory_space<vmem>>, vector<1x64xf32>
    tpu.vector_store %arg24[%c4_116, %c0_117], %171 {strides = array<i32>} : memref<8x64xf32, #tpu.memory_space<vmem>>, vector<1x64xf32>,
    %c5 = arith.constant 5 : index
    %c0_118 = arith.constant 0 : index
    %173 = vector.load %arg20[%c5, %c0_118] : memref<8x64xf32, #tpu.memory_space<vmem>>, vector<1x64xf32>
    %c5_119 = arith.constant 5 : index
    %c0_120 = arith.constant 0 : index
    %174 = vector.load %arg21[%c5_119, %c0_120] : memref<8x64xf32, #tpu.memory_space<vmem>>, vector<1x64xf32>
    %c0_121 = arith.constant 0 : index
    %c5_122 = arith.constant 5 : index
    %175 = vector.load %arg22[%c0_121, %c5_122] : memref<8x8xf32, #tpu.memory_space<vmem>>, vector<8x1xf32>
    %c0_123 = arith.constant 0 : index
    %c5_124 = arith.constant 5 : index
    %176 = vector.load %arg23[%c0_123, %c5_124] : memref<8x8xf32, #tpu.memory_space<vmem>>, vector<8x1xf32>
    %177 = vector.broadcast %173 : vector<1x64xf32> to vector<8x64xf32>
    %178 = arith.mulf %177, %79 : vector<8x64xf32>
    %179 = math.exp %178 : vector<8x64xf32>
    %180 = arith.mulf %179, %167 : vector<8x64xf32>
    %181 = vector.broadcast %175 : vector<8x1xf32> to vector<8x64xf32>
    %182 = vector.broadcast %174 : vector<1x64xf32> to vector<8x64xf32>
    %183 = arith.mulf %181, %182 : vector<8x64xf32>
    %184 = arith.addf %180, %183 : vector<8x64xf32>
    %185 = vector.broadcast %176 : vector<8x1xf32> to vector<8x64xf32>
    %186 = arith.mulf %185, %184 : vector<8x64xf32>
    %cst_125 = arith.constant dense<0.000000e+00> : vector<64xf32>
    %187 = vector.multi_reduction <add>, %186, %cst_125 [0] : vector<8x64xf32> to vector<64xf32>
    %188 = vector.shape_cast %187 : vector<64xf32> to vector<1x64xf32>
    %c5_126 = arith.constant 5 : index
    %c0_127 = arith.constant 0 : index
    %189 = vector.load %arg24[%c5_126, %c0_127] : memref<8x64xf32, #tpu.memory_space<vmem>>, vector<1x64xf32>
    tpu.vector_store %arg24[%c5_126, %c0_127], %188 {strides = array<i32>} : memref<8x64xf32, #tpu.memory_space<vmem>>, vector<1x64xf32>,
    %c6 = arith.constant 6 : index
    %c0_128 = arith.constant 0 : index
    %190 = vector.load %arg20[%c6, %c0_128] : memref<8x64xf32, #tpu.memory_space<vmem>>, vector<1x64xf32>
    %c6_129 = arith.constant 6 : index
    %c0_130 = arith.constant 0 : index
    %191 = vector.load %arg21[%c6_129, %c0_130] : memref<8x64xf32, #tpu.memory_space<vmem>>, vector<1x64xf32>
    %c0_131 = arith.constant 0 : index
    %c6_132 = arith.constant 6 : index
    %192 = vector.load %arg22[%c0_131, %c6_132] : memref<8x8xf32, #tpu.memory_space<vmem>>, vector<8x1xf32>
    %c0_133 = arith.constant 0 : index
    %c6_134 = arith.constant 6 : index
    %193 = vector.load %arg23[%c0_133, %c6_134] : memref<8x8xf32, #tpu.memory_space<vmem>>, vector<8x1xf32>
    %194 = vector.broadcast %190 : vector<1x64xf32> to vector<8x64xf32>
    %195 = arith.mulf %194, %79 : vector<8x64xf32>
    %196 = math.exp %195 : vector<8x64xf32>
    %197 = arith.mulf %196, %184 : vector<8x64xf32>
    %198 = vector.broadcast %192 : vector<8x1xf32> to vector<8x64xf32>
    %199 = vector.broadcast %191 : vector<1x64xf32> to vector<8x64xf32>
    %200 = arith.mulf %198, %199 : vector<8x64xf32>
    %201 = arith.addf %197, %200 : vector<8x64xf32>
    %202 = vector.broadcast %193 : vector<8x1xf32> to vector<8x64xf32>
    %203 = arith.mulf %202, %201 : vector<8x64xf32>
    %cst_135 = arith.constant dense<0.000000e+00> : vector<64xf32>
    %204 = vector.multi_reduction <add>, %203, %cst_135 [0] : vector<8x64xf32> to vector<64xf32>
    %205 = vector.shape_cast %204 : vector<64xf32> to vector<1x64xf32>
    %c6_136 = arith.constant 6 : index
    %c0_137 = arith.constant 0 : index
    %206 = vector.load %arg24[%c6_136, %c0_137] : memref<8x64xf32, #tpu.memory_space<vmem>>, vector<1x64xf32>
    tpu.vector_store %arg24[%c6_136, %c0_137], %205 {strides = array<i32>} : memref<8x64xf32, #tpu.memory_space<vmem>>, vector<1x64xf32>,
    %c7 = arith.constant 7 : index
    %c0_138 = arith.constant 0 : index
    %207 = vector.load %arg20[%c7, %c0_138] : memref<8x64xf32, #tpu.memory_space<vmem>>, vector<1x64xf32>
    %c7_139 = arith.constant 7 : index
    %c0_140 = arith.constant 0 : index
    %208 = vector.load %arg21[%c7_139, %c0_140] : memref<8x64xf32, #tpu.memory_space<vmem>>, vector<1x64xf32>
    %c0_141 = arith.constant 0 : index
    %c7_142 = arith.constant 7 : index
    %209 = vector.load %arg22[%c0_141, %c7_142] : memref<8x8xf32, #tpu.memory_space<vmem>>, vector<8x1xf32>
    %c0_143 = arith.constant 0 : index
    %c7_144 = arith.constant 7 : index
    %210 = vector.load %arg23[%c0_143, %c7_144] : memref<8x8xf32, #tpu.memory_space<vmem>>, vector<8x1xf32>
    %211 = vector.broadcast %207 : vector<1x64xf32> to vector<8x64xf32>
    %212 = arith.mulf %211, %79 : vector<8x64xf32>
    %213 = math.exp %212 : vector<8x64xf32>
    %214 = arith.mulf %213, %201 : vector<8x64xf32>
    %215 = vector.broadcast %209 : vector<8x1xf32> to vector<8x64xf32>
    %216 = vector.broadcast %208 : vector<1x64xf32> to vector<8x64xf32>
    %217 = arith.mulf %215, %216 : vector<8x64xf32>
    %218 = arith.addf %214, %217 : vector<8x64xf32>
    %219 = vector.broadcast %210 : vector<8x1xf32> to vector<8x64xf32>
    %220 = arith.mulf %219, %218 : vector<8x64xf32>
    %cst_145 = arith.constant dense<0.000000e+00> : vector<64xf32>
    %221 = vector.multi_reduction <add>, %220, %cst_145 [0] : vector<8x64xf32> to vector<64xf32>
    %222 = vector.shape_cast %221 : vector<64xf32> to vector<1x64xf32>
    %c7_146 = arith.constant 7 : index
    %c0_147 = arith.constant 0 : index
    %223 = vector.load %arg24[%c7_146, %c0_147] : memref<8x64xf32, #tpu.memory_space<vmem>>, vector<1x64xf32>
    tpu.vector_store %arg24[%c7_146, %c0_147], %222 {strides = array<i32>} : memref<8x64xf32, #tpu.memory_space<vmem>>, vector<1x64xf32>,
    %c0_148 = arith.constant 0 : index
    %c0_149 = arith.constant 0 : index
    %224 = vector.load %arg24[%c0_148, %c0_149] : memref<8x64xf32, #tpu.memory_space<vmem>>, vector<8x64xf32>
    %c0_150 = arith.constant 0 : index
    %c0_151 = arith.constant 0 : index
    %225 = vector.load %arg12[%c0_150, %c0_151] : memref<1x64xf32, #tpu.memory_space<vmem>>, vector<1x64xf32>
    %226 = vector.broadcast %225 : vector<1x64xf32> to vector<8x64xf32>
    %227 = arith.mulf %54, %226 : vector<8x64xf32>
    %228 = arith.addf %224, %227 : vector<8x64xf32>
    %cst_152 = arith.constant 0.000000e+00 : f32
    %229 = vector.broadcast %cst_152 : f32 to vector<8x64xf32>
    %230 = arith.subf %229, %21 : vector<8x64xf32>
    %231 = math.exp %230 : vector<8x64xf32>
    %cst_153 = arith.constant 1.000000e+00 : f32
    %232 = vector.broadcast %cst_153 : f32 to vector<8x64xf32>
    %233 = arith.addf %232, %231 : vector<8x64xf32>
    %234 = arith.divf %21, %233 : vector<8x64xf32>
    %235 = arith.mulf %228, %234 : vector<8x64xf32>
    %c0_154 = arith.constant 0 : index
    %c0_155 = arith.constant 0 : index
    %236 = vector.load %arg13[%c0_154, %c0_155] : memref<64x32xf32, #tpu.memory_space<vmem>>, vector<64x32xf32>
    %cst_156 = arith.constant dense<0.000000e+00> : vector<8x32xf32>
    %237 = tpu.matmul %235, %236, %cst_156 {dimension_numbers = #tpu.dot_dimension_numbers<[1], [0], [0], [1], [0, 0, 1, 1], [], []>} : vector<8x64xf32>, vector<64x32xf32>, vector<8x32xf32> -> vector<8x32xf32>
    %238 = arith.addf %1, %237 : vector<8x32xf32>
    %cst_157 = arith.constant dense<0.000000e+00> : vector<8xf32>
    %239 = vector.multi_reduction <add>, %238, %cst_157 [1] : vector<8x32xf32> to vector<8xf32>
    %240 = vector.shape_cast %239 : vector<8xf32> to vector<8x1xf32>
    %cst_158 = arith.constant 3.200000e+01 : f32
    %241 = vector.broadcast %cst_158 : f32 to vector<8x1xf32>
    %242 = arith.divf %240, %241 : vector<8x1xf32>
    %243 = vector.broadcast %242 : vector<8x1xf32> to vector<8x32xf32>
    %244 = arith.subf %238, %243 : vector<8x32xf32>
    %245 = arith.mulf %244, %244 : vector<8x32xf32>
    %cst_159 = arith.constant dense<0.000000e+00> : vector<8xf32>
    %246 = vector.multi_reduction <add>, %245, %cst_159 [1] : vector<8x32xf32> to vector<8xf32>
    %247 = vector.shape_cast %246 : vector<8xf32> to vector<8x1xf32>
    %cst_160 = arith.constant 3.200000e+01 : f32
    %248 = vector.broadcast %cst_160 : f32 to vector<8x1xf32>
    %249 = arith.divf %247, %248 : vector<8x1xf32>
    %cst_161 = arith.constant 9.99999974E-6 : f32
    %250 = vector.broadcast %cst_161 : f32 to vector<8x1xf32>
    %251 = arith.addf %249, %250 : vector<8x1xf32>
    %252 = math.rsqrt %251 : vector<8x1xf32>
    %253 = vector.broadcast %252 : vector<8x1xf32> to vector<8x32xf32>
    %254 = arith.mulf %244, %253 : vector<8x32xf32>
    %c0_162 = arith.constant 0 : index
    %c0_163 = arith.constant 0 : index
    %255 = vector.load %arg14[%c0_162, %c0_163] : memref<8x8xf32, #tpu.memory_space<vmem>>, vector<8x8xf32>
    %c0_164 = arith.constant 0 : index
    %c0_165 = arith.constant 0 : index
    %256 = vector.load %arg15[%c0_164, %c0_165] : memref<8x8xf32, #tpu.memory_space<vmem>>, vector<8x8xf32>
    %cst_166 = arith.constant dense<0.000000e+00> : vector<8x32xf32>
    %257 = tpu.matmul %255, %254, %cst_166 {dimension_numbers = #tpu.dot_dimension_numbers<[1], [0], [0], [1], [0, 0, 1, 1], [], []>} : vector<8x8xf32>, vector<8x32xf32>, vector<8x32xf32> -> vector<8x32xf32>
    %cst_167 = arith.constant dense<0.000000e+00> : vector<8x32xf32>
    %258 = tpu.matmul %256, %254, %cst_167 {dimension_numbers = #tpu.dot_dimension_numbers<[1], [0], [0], [1], [0, 0, 1, 1], [], []>} : vector<8x8xf32>, vector<8x32xf32>, vector<8x32xf32> -> vector<8x32xf32>
    %c0_168 = arith.constant 0 : index
    %c0_169 = arith.constant 0 : index
    %259 = vector.load %arg16[%c0_168, %c0_169] : memref<8x32xf32, #tpu.memory_space<vmem>>, vector<8x32xf32>
    %c0_170 = arith.constant 0 : index
    %c0_171 = arith.constant 0 : index
    %260 = vector.load %arg17[%c0_170, %c0_171] : memref<8x32xf32, #tpu.memory_space<vmem>>, vector<8x32xf32>
    %261 = arith.mulf %257, %259 : vector<8x32xf32>
    %262 = arith.mulf %258, %260 : vector<8x32xf32>
    %263 = arith.subf %261, %262 : vector<8x32xf32>
    %264 = arith.mulf %257, %260 : vector<8x32xf32>
    %265 = arith.mulf %258, %259 : vector<8x32xf32>
    %266 = arith.addf %264, %265 : vector<8x32xf32>
    %cst_172 = arith.constant 0.000000e+00 : f32
    %267 = vector.broadcast %cst_172 : f32 to vector<8x32xf32>
    %268 = arith.subf %267, %263 : vector<8x32xf32>
    %269 = math.exp %268 : vector<8x32xf32>
    %270 = math.cos %266 : vector<8x32xf32>
    %271 = arith.mulf %269, %270 : vector<8x32xf32>
    %cst_173 = arith.constant 1.000000e+00 : f32
    %272 = vector.broadcast %cst_173 : f32 to vector<8x32xf32>
    %273 = arith.addf %272, %271 : vector<8x32xf32>
    %cst_174 = arith.constant 0.000000e+00 : f32
    %274 = vector.broadcast %cst_174 : f32 to vector<8x32xf32>
    %275 = arith.subf %274, %269 : vector<8x32xf32>
    %276 = math.sin %266 : vector<8x32xf32>
    %277 = arith.mulf %275, %276 : vector<8x32xf32>
    %278 = arith.mulf %273, %273 : vector<8x32xf32>
    %279 = arith.mulf %277, %277 : vector<8x32xf32>
    %280 = arith.addf %278, %279 : vector<8x32xf32>
    %cst_175 = arith.constant 1.000000e+00 : f32
    %281 = vector.broadcast %cst_175 : f32 to vector<8x32xf32>
    %282 = arith.divf %281, %280 : vector<8x32xf32>
    %283 = arith.mulf %263, %273 : vector<8x32xf32>
    %284 = arith.mulf %266, %277 : vector<8x32xf32>
    %285 = arith.addf %283, %284 : vector<8x32xf32>
    %286 = arith.mulf %285, %282 : vector<8x32xf32>
    %287 = arith.mulf %266, %273 : vector<8x32xf32>
    %288 = arith.mulf %263, %277 : vector<8x32xf32>
    %289 = arith.subf %287, %288 : vector<8x32xf32>
    %290 = arith.mulf %289, %282 : vector<8x32xf32>
    %cst_176 = arith.constant dense<0.000000e+00> : vector<8x32xf32>
    %291 = tpu.matmul %255, %286, %cst_176 {dimension_numbers = #tpu.dot_dimension_numbers<[1], [0], [0], [1], [0, 0, 1, 1], [], []>} : vector<8x8xf32>, vector<8x32xf32>, vector<8x32xf32> -> vector<8x32xf32>
    %cst_177 = arith.constant dense<0.000000e+00> : vector<8x32xf32>
    %292 = tpu.matmul %256, %290, %cst_177 {dimension_numbers = #tpu.dot_dimension_numbers<[1], [0], [0], [1], [0, 0, 1, 1], [], []>} : vector<8x8xf32>, vector<8x32xf32>, vector<8x32xf32> -> vector<8x32xf32>
    %293 = arith.addf %291, %292 : vector<8x32xf32>
    %cst_178 = arith.constant 1.250000e-01 : f32
    %294 = vector.broadcast %cst_178 : f32 to vector<8x32xf32>
    %295 = arith.mulf %293, %294 : vector<8x32xf32>
    %296 = arith.addf %238, %295 : vector<8x32xf32>
    %c0_179 = arith.constant 0 : index
    %c0_180 = arith.constant 0 : index
    %c0_181 = arith.constant 0 : index
    %297 = vector.load %arg18[%c0_179, %c0_180, %c0_181] : memref<1x8x32xf32, #tpu.memory_space<vmem>>, vector<1x8x32xf32>
    %298 = vector.shape_cast %297 : vector<1x8x32xf32> to vector<8x32xf32>
    %299 = vector.shape_cast %296 : vector<8x32xf32> to vector<1x8x32xf32>
    tpu.vector_store %arg18[%c0_179, %c0_180, %c0_181], %299 {strides = array<i32>} : memref<1x8x32xf32, #tpu.memory_space<vmem>>, vector<1x8x32xf32>,
    return
  }
  func.func @transform_0(%arg0: i32) -> (i32, i32, i32) {
    %c0_i32 = arith.constant 0 : i32
    %c0_i32_0 = arith.constant 0 : i32
    %c0_i32_1 = arith.constant 0 : i32
    return %arg0, %c0_i32, %c0_i32_0 : i32, i32, i32
  }
  func.func @transform_1(%arg0: i32) -> (i32, i32) {
    %c0_i32 = arith.constant 0 : i32
    %c0_i32_0 = arith.constant 0 : i32
    %c0_i32_1 = arith.constant 0 : i32
    return %c0_i32, %c0_i32_0 : i32, i32
  }
  func.func @transform_2(%arg0: i32) -> (i32, i32) {
    %c0_i32 = arith.constant 0 : i32
    %c0_i32_0 = arith.constant 0 : i32
    %c0_i32_1 = arith.constant 0 : i32
    return %c0_i32, %c0_i32_0 : i32, i32
  }
  func.func @transform_3(%arg0: i32) -> (i32, i32) {
    %c0_i32 = arith.constant 0 : i32
    %c0_i32_0 = arith.constant 0 : i32
    %c0_i32_1 = arith.constant 0 : i32
    return %c0_i32, %c0_i32_0 : i32, i32
  }
  func.func @transform_4(%arg0: i32) -> (i32, i32) {
    %c0_i32 = arith.constant 0 : i32
    %c0_i32_0 = arith.constant 0 : i32
    %c0_i32_1 = arith.constant 0 : i32
    return %c0_i32, %c0_i32_0 : i32, i32
  }
  func.func @transform_5(%arg0: i32) -> (i32, i32) {
    %c0_i32 = arith.constant 0 : i32
    %c0_i32_0 = arith.constant 0 : i32
    %c0_i32_1 = arith.constant 0 : i32
    return %c0_i32, %c0_i32_0 : i32, i32
  }
  func.func @transform_6(%arg0: i32) -> (i32, i32) {
    %c0_i32 = arith.constant 0 : i32
    %c0_i32_0 = arith.constant 0 : i32
    %c0_i32_1 = arith.constant 0 : i32
    return %c0_i32, %c0_i32_0 : i32, i32
  }
  func.func @transform_7(%arg0: i32) -> (i32, i32) {
    %c0_i32 = arith.constant 0 : i32
    %c0_i32_0 = arith.constant 0 : i32
    %c0_i32_1 = arith.constant 0 : i32
    return %c0_i32, %c0_i32_0 : i32, i32
  }
  func.func @transform_8(%arg0: i32) -> (i32, i32) {
    %c0_i32 = arith.constant 0 : i32
    %c0_i32_0 = arith.constant 0 : i32
    %c0_i32_1 = arith.constant 0 : i32
    return %c0_i32, %c0_i32_0 : i32, i32
  }
  func.func @transform_9(%arg0: i32) -> (i32, i32) {
    %c0_i32 = arith.constant 0 : i32
    %c0_i32_0 = arith.constant 0 : i32
    %c0_i32_1 = arith.constant 0 : i32
    return %c0_i32, %c0_i32_0 : i32, i32
  }
  func.func @transform_10(%arg0: i32) -> (i32, i32) {
    %c0_i32 = arith.constant 0 : i32
    %c0_i32_0 = arith.constant 0 : i32
    %c0_i32_1 = arith.constant 0 : i32
    return %c0_i32, %c0_i32_0 : i32, i32
  }
  func.func @transform_11(%arg0: i32) -> (i32, i32) {
    %c0_i32 = arith.constant 0 : i32
    %c0_i32_0 = arith.constant 0 : i32
    %c0_i32_1 = arith.constant 0 : i32
    return %c0_i32, %c0_i32_0 : i32, i32
  }
  func.func @transform_12(%arg0: i32) -> (i32, i32) {
    %c0_i32 = arith.constant 0 : i32
    %c0_i32_0 = arith.constant 0 : i32
    %c0_i32_1 = arith.constant 0 : i32
    return %c0_i32, %c0_i32_0 : i32, i32
  }
  func.func @transform_13(%arg0: i32) -> (i32, i32) {
    %c0_i32 = arith.constant 0 : i32
    %c0_i32_0 = arith.constant 0 : i32
    %c0_i32_1 = arith.constant 0 : i32
    return %c0_i32, %c0_i32_0 : i32, i32
  }
  func.func @transform_14(%arg0: i32) -> (i32, i32) {
    %c0_i32 = arith.constant 0 : i32
    %c0_i32_0 = arith.constant 0 : i32
    %c0_i32_1 = arith.constant 0 : i32
    return %c0_i32, %c0_i32_0 : i32, i32
  }
  func.func @transform_15(%arg0: i32) -> (i32, i32) {
    %c0_i32 = arith.constant 0 : i32
    %c0_i32_0 = arith.constant 0 : i32
    %c0_i32_1 = arith.constant 0 : i32
    return %c0_i32, %c0_i32_0 : i32, i32
  }
  func.func @transform_16(%arg0: i32) -> (i32, i32) {
    %c0_i32 = arith.constant 0 : i32
    %c0_i32_0 = arith.constant 0 : i32
    %c0_i32_1 = arith.constant 0 : i32
    return %c0_i32, %c0_i32_0 : i32, i32
  }
  func.func @transform_17(%arg0: i32) -> (i32, i32, i32) {
    %c0_i32 = arith.constant 0 : i32
    %c0_i32_0 = arith.constant 0 : i32
    %c0_i32_1 = arith.constant 0 : i32
    return %arg0, %c0_i32, %c0_i32_0 : i32, i32, i32
  }
}

</mosaic_0001>

<bundles_post_ra>
// kernel: tpu_custom_call.1
= control target key start
LH: loop header
LB: loop body
LE: loop exit
PB: predicated region body
PF: predicated region fallthrough
CT: control target
= control target key end

     0   :  { %s3108_s0 = inlined_call_operand.vmem [shape: f32[2,8,32], index: 0, kind: input, shape index: {}]   ;;  %s3109_s1 = inlined_call_operand.vmem [shape: f32[32,64], index: 1, kind: input, shape index: {}]   ;;  %s3110_s2 = inlined_call_operand.vmem [shape: f32[32,64], index: 2, kind: input, shape index: {}]   ;;  %s3111_s3 = inlined_call_operand.vmem [shape: f32[4,64], index: 3, kind: input, shape index: {}]   ;;  %s3112_s4 = inlined_call_operand.vmem [shape: f32[1,64], index: 4, kind: input, shape index: {}]   ;;  %s3113_s5 = inlined_call_operand.vmem [shape: f32[64,2], index: 5, kind: input, shape index: {}]   ;;  %s3114_s6 = inlined_call_operand.vmem [shape: f32[64,8], index: 6, kind: input, shape index: {}]   ;;  %s3115_s7 = inlined_call_operand.vmem [shape: f32[64,8], index: 7, kind: input, shape index: {}]   ;;  %s3116_s8 = inlined_call_operand.vmem [shape: f32[2,64], index: 8, kind: input, shape index: {}]   ;;  %s3117_s9 = inlined_call_operand.vmem [shape: f32[1,64], index: 9, kind: input, shape index: {}]   ;;  %s3118_s10 = inlined_call_operand.vmem [shape: f32[8,64], index: 10, kind: input, shape index: {}]   ;;  %s3119_s11 = inlined_call_operand.vmem [shape: f32[1,64], index: 11, kind: input, shape index: {}]   ;;  %s3120_s12 = inlined_call_operand.vmem [shape: f32[64,32], index: 12, kind: input, shape index: {}]   ;;  %s3121_s13 = inlined_call_operand.vmem [shape: f32[8,8], index: 13, kind: input, shape index: {}]   ;;  %s3122_s14 = inlined_call_operand.vmem [shape: f32[8,8], index: 14, kind: input, shape index: {}]   ;;  %s3123_s15 = inlined_call_operand.vmem [shape: f32[8,32], index: 15, kind: input, shape index: {}]   ;;  %s3124_s16 = inlined_call_operand.vmem [shape: f32[8,32], index: 16, kind: input, shape index: {}]   ;;  %s3125_s17 = inlined_call_operand.hbm [shape: f32[2,8,32], index: 17, kind: output, shape index: {}]  }
   0x1   :  { %3132 = sst [smem:[#allocation15_spill]] %s3108_s0 }
   0x2   :  { %3133 = sst [smem:[#allocation16_spill]] %s3109_s1 }
   0x3   :  { %3134 = sst [smem:[#allocation17_spill]] %s3110_s2 }
   0x4   :  { %3135 = sst [smem:[#allocation18_spill]] %s3111_s3 }
   0x5   :  { %22 = vsyncpa [#allocation9], 0 }
   0x6   :  { %24 = vsyncpa [#allocation9 + $0x1], 0  ;;  %s2693_s24 = smov 0   ;;  %s2695_s25 = smov 0  }
   0x7   :  { %s2697_s26 = smov 0   ;;  %s2699_s27 = smov 0  }
   0x8 LB: > { %3136 = sst [smem:[#allocation11_spill]] %s2580_s26  ;;  %s2714_s28 = sadd.s32 4294967295, %s2584_s27   ;;  %s2584_s27 = sphi %s2699_s27, %s3148_s27   ;;  %s2580_s26 = sphi %s2697_s26, %s3150_s26   ;;  %s2576_s25 = sphi %s2695_s25, %s3152_s25   ;;  %s2572_s24 = sphi %s2693_s24, %s3151_s24  }
   0x9   : > { %s2175_s29 = sadd.s32 4294967294, %s2584_s27   ;;  %s2718_s0 = sadd.s32 1, %s2584_s27  }
   0xa   : > { %3137 = sst [smem:[#allocation12_spill]] %s2718_s0  ;;  %s399_s30 = sadd.s32 1, %s2580_s26 }
   0xb   : > { %s396_s18 = ssub.s32 %s2584_s27, %s2718_s0  ;;  %p409_p0 = scmp.ne.s32.totalorder %s2580_s26, %s2576_s25 }
   0xc   : > { %p397_p1 = scmp.eq.s32.totalorder %s396_s18, 0  ;;  %p410_p2 = scmp.eq.s32.totalorder %s2714_s28, 1 }
   0xd   : > { %p415_p3 = scmp.ne.s32.totalorder %s2576_s25, %s2572_s24  ;;  %p416_p4 = scmp.eq.s32.totalorder %s2175_s29, 1 }
   0xe   : > { %s2729_s19 = scalar_select %p397_p1, %s2580_s26, %s399_s30  }
   0xf   : > { %p2731_p5 = por %p410_p2, %p409_p0  ;;  %p2735_p6 = por %p416_p4, %p415_p3 }
  0x10   : > { %3138 = sst [smem:[#allocation13_spill]] %s2729_s19  ;;  %p2178_p7 = scmp.ge.s32.totalorder %s2584_s27, 1 }
  0x11   : > { %s3140_s20 = scalar_select %p2735_p6, 1, 0 }
  0x12   : > { %p489_p8 = scmp.lt.s32.totalorder %s2584_s27, 3 }
  0x13   : > { %3141 = sst [smem:[#allocation14_spill]] %s3140_s20 }
  0x14   : > { %p490_p9 = pnand %p2178_p7, %p489_p8 }
  0x15   : > { %p540_p10 = scmp.lt.s32.totalorder (!%p490_p9), %s2714_s28, 1  ;;  %s3142_s30 = sld [smem:[#allocation15_spill]] (!%p490_p9) }
  0x16   : > { %493 = sbr.rel (%p490_p9) target bundleno = 2130 (0x852), region = 88  ;;  %s3143_s26 = sld [smem:[#allocation16_spill]] (!%p490_p9) }
  0x17   : > { %s3145_s2 = sld [smem:[#allocation17_spill]] (!%p490_p9)  ;;  %s2225_s19 = sshll.u32 (!%p490_p9), %s2714_s28, 7 }
  0x18   : > { %s3146_s3 = sld [smem:[#allocation18_spill]] (!%p490_p9)  ;;  %s2114_s29 = scalar_lea.hbm (!%p490_p9), %s3125_s17, %s2225_s19 }
  0x1b   : > { %s541_s21 = scalar_select %p540_p10, %s2714_s28, 1  ;;  %vm545_vm0 = vcmask 261120   ;;  %v2586_v9 = vmov 0.0   ;;  %vm2587_vm1 = vmmov 0   ;;  %vm711_vm2 = vcmask 518144   ;;  %v768_v21 = vld [vmem:[%s3113_s5 + $0x38] sm:$0xff] }
  0x1c   : > { %s3144_s0 = smov %s3143_s26  ;;  %v563_v7 = vld [vmem:[%s3143_s26 + $0x18] sm:$0xff]  ;;  %2284 = vmatprep.subr.mxu0 %v2586_v9  ;;  %2295 = vmatprep.subr.mxu1 %v2586_v9  ;;  %712 = vst.msk [vmem:[#allocation2] sm:$0x7] %vm711_vm2, %v2586_v9  ;;  %v767_v23 = vld [vmem:[%s3113_s5 + $0x30] sm:$0xff]  ;;  %v766_v25 = vld [vmem:[%s3113_s5 + $0x28] sm:$0xff]  ;;  %vm713_vm3 = vcmask 523264  }
  0x1d   : > { %s2180_s22 = sshll.u32 %s541_s21, 3  ;;  %v640_v8 = vld [vmem:[%s3145_s2 + $0x18] sm:$0xff]  ;;  %v562_v10 = vld [vmem:[%s3144_s0 + $0x10] sm:$0xff]  ;;  %2285 = vmatpush3.msra.mxu0 %v563_v7  ;;  %v561_v12 = vld [vmem:[%s3144_s0 + $0x8] sm:$0xff]  ;;  %2292 = vmatprep.mubr.msk.f32.mxu0 %vm2587_vm1, %v2586_v9  ;;  %vm1010_vm4 = vcmask 1041408   ;;  %vm1006_vm5 = vcmask 15360  }
  0x1e   : > { %s543_s18 = scalar_lea.vmem %s3142_s30, %s2180_s22  ;;  %v639_v11 = vld [vmem:[%s3145_s2 + $0x10] sm:$0xff]  ;;  %2296 = vmatpush3.msra.mxu1 %v640_v8  ;;  %2286 = vmatprep.subr.mxu0 %v2586_v9  ;;  %v638_v13 = vld [vmem:[%s3145_s2 + $0x8] sm:$0xff]  ;;  %v560_v14 = vld [vmem:[%s3144_s0] sm:$0xff]  ;;  %vm1132_vm6 = vcmask 64512   ;;  %vm1203_vm7 = vcmask 516096  }
  0x1f   : > { %v2746_v0 = vld [vmem:[%s543_s18] sm:$0xff]  ;;  %2297 = vmatprep.subr.mxu1 %v2586_v9  ;;  %2287 = vmatpush3.msra.mxu0 %v562_v10  ;;  %v849_v22 = vld [vmem:[%s3114_s6 + $0x38] sm:$0xff]  ;;  %v848_v24 = vld [vmem:[%s3114_s6 + $0x30] sm:$0xff]  ;;  %s537_s18 = sand.u32 1, %s2576_s25  }
  0x20   : > { %v546_v1 = vsel %vm545_vm0, %v2746_v0, 0.0  ;;  %2298 = vmatpush3.msra.mxu1 %v639_v11  ;;  %2288 = vmatprep.subr.mxu0 %v2586_v9  ;;  %v637_v15 = vld [vmem:[%s3145_s2] sm:$0xff]  ;;  %v847_v26 = vld [vmem:[%s3114_s6 + $0x28] sm:$0xff]  ;;  %v764_v29 = vld [vmem:[%s3113_s5 + $0x18] sm:$0xff]  ;;  %v2588_v11 = vmov 0   ;;  %s2179_s26 = sshll.u32 %s537_s18, 3 }
  0x21   : > { %547 = vadd.xlane.f32.xlu0 %v546_v1  ;;  %2299 = vmatprep.subr.mxu1 %v2586_v9  ;;  %v765_v27 = vld [vmem:[%s3113_s5 + $0x20] sm:$0xff]  ;;  %v845_v30 = vld [vmem:[%s3114_s6 + $0x18] sm:$0xff]  ;;  %v763_v31 = vld [vmem:[%s3113_s5 + $0x10] sm:$0xff]  ;;  %s539_s21 = scalar_lea.vmem [#allocation8], %s2179_s26  ;;  %s2103_s30 = scalar_lea.sflag [#allocation9], %s537_s18 }
  0x22   : > { %2289 = vmatpush3.msra.mxu0 %v561_v12  ;;  %2300 = vmatpush3.msra.mxu1 %v638_v13  ;;  %v846_v28 = vld [vmem:[%s3114_s6 + $0x20] sm:$0xff]  ;;  %v844_v32 = vld [vmem:[%s3114_s6 + $0x10] sm:$0xff]  ;;  %v762_v33 = vld [vmem:[%s3113_s5 + $0x8] sm:$0xff]  ;;  %s2116_s23 = sshll.u32 %s539_s21, 4  ;;  %s2602_s2 = smov [#allocation8]   ;;  %s2117_s23 = int_to_ptr.vmem [resolvable:$true] %s2116_s23 }
  0x23   : > { %2290 = vmatprep.subr.mxu0 %v2586_v9  ;;  %2301 = vmatprep.subr.mxu1 %v2586_v9  ;;  %v843_v34 = vld [vmem:[%s3114_s6 + $0x8] sm:$0xff]  ;;  %v761_v35 = vld [vmem:[%s3113_s5] sm:$0xff]  ;;  %v927_v1 = vld [vmem:[%s3115_s7 + $0x38] sm:$0xff]  ;;  %s2524_s0 = scalar_lea.vmem %s2117_s23, 128  ;;  %s2528_s28 = sshll.u32 %s2602_s2, 4  ;;  %s2529_s28 = int_to_ptr.vmem [resolvable:$false] %s2528_s28 }
  0x24   : > { %2291 = vmatpush3.msra.mxu0 %v560_v14  ;;  %2302 = vmatpush3.msra.mxu1 %v637_v15  ;;  %v842_v36 = vld [vmem:[%s3114_s6] sm:$0xff]  ;;  %v921_v7 = vld [vmem:[%s3115_s7 + $0x8] sm:$0xff]  ;;  %p2525_p11 = scmp.ne.s32.totalorder %s2117_s23, %s2524_s0  ;;  %s2530_s26 = scalar_lea.vmem %s2529_s28, 256 }
  0x25   : > { %2303 = vmatprep.mubr.msk.f32.mxu1 %vm2587_vm1, %v2586_v9  ;;  %2306 = vmatprep.subr.mxu0 %v2586_v9  ;;  %v2184_v41 = vld [vmem:[%s3146_s3] ss:$0 sm:$0xff]  ;;  %v2185_v42 = vld [vmem:[%s3146_s3 + $0x1] ss:$0 sm:$0xff]  ;;  %v2186_v48 = vld [vmem:[%s3146_s3 + $0x2] ss:$0 sm:$0xff]  ;;  %p2531_p0 = scmp.lt.s32.totalorder %s2117_s23, %s2529_s28  ;;  %p2532_p1 = scmp.lt.s32.totalorder %s2530_s26, %s2524_s0 }
  0x26   : > { %2325 = vmatprep.subr.mxu1 %v2586_v9  ;;  %v2183_v43 = vld [vmem:[%s3112_s4] ss:$0 sm:$0xff]  ;;  %v2187_v52 = vld [vmem:[%s3146_s3 + $0x3] ss:$0 sm:$0xff]  ;;  %2466 = vset.pattern.permute.xlu0 %v2588_v11  ;;  %p2526_p12 = pnand %p2525_p11, %p2731_p5 }
  0x27   : > { %v920_v8 = vld [vmem:[%s3115_s7] sm:$0xff]  ;;  %p2533_p2 = por %p2532_p1, %p2531_p0 }
  0x28   : > { %v998_v10 = vld [vmem:[%s3116_s8] sm:$0x3]  ;;  %p2527_p13 = pneg %p2526_p12 }
  0x2a   : > { %p2534_p3 = pnand %p2533_p2, %p2527_p13 }
  0xaa   : > { %v548_v2 = vpop.xlane.xlu0 %547 }
  0xab   : > { %v550_v3 = vmul.f32 0.03125, %v548_v2  ;;  %v926_v2 = vld [vmem:[%s3115_s7 + $0x30] sm:$0xff] }
  0xad   : > { %v551_v4 = vsub.f32 %v2746_v0, %v550_v3  ;;  %v925_v3 = vld [vmem:[%s3115_s7 + $0x28] sm:$0xff] }
  0xaf   : > { %v552_v5 = vmul.f32 %v551_v4, %v551_v4 }
  0xb1   : > { %v553_v6 = vsel %vm545_vm0, %v552_v5, 0.0  ;;  %v923_v5 = vld [vmem:[%s3115_s7 + $0x18] sm:$0xff] }
  0xb2   : > { %554 = vadd.xlane.f32.xlu0 %v553_v6  ;;  %v922_v6 = vld [vmem:[%s3115_s7 + $0x10] sm:$0xff] }
 0x13b   : > { %v555_v16 = vpop.xlane.xlu0 %554 }
 0x13c   : > { %v556_v17 = vmul.f32 0.03125, %v555_v16 }
 0x13e   : > { %v557_v18 = vadd.f32 1e-05, %v556_v17 }
 0x140   : > { %2482 = vrsqrt.f32 %v557_v18  ;;  %v2589_v18 = vmov 1  }
 0x14d   : > { %v2483_v19 = vpop.eup %2482 }
 0x14e   : > { %v559_v20 = vmul.f32 %v2483_v19, %v551_v4  ;;  %v924_v4 = vld [vmem:[%s3115_s7 + $0x20] sm:$0xff] }
 0x150   : > { %2293 = vmatmul.mubr.msk.f32.vlgmr.msra.gmra.mxu0 %vm545_vm0, %v559_v20  ;;  %2304 = vmatmul.mubr.msk.f32.vlgmr.msra.gmra.mxu1 %vm545_vm0, %v559_v20 }
 0x151   : > { %2322 = vmatprep.mubr.msk.f32.mxu0 %vm2587_vm1, %v2586_v9  ;;  %2341 = vmatprep.mubr.msk.f32.mxu1 %vm2587_vm1, %v2586_v9 }
 0x152   : > { %2307 = vmatpush3.msra.mxu0 %v768_v21  ;;  %2326 = vmatpush3.msra.mxu1 %v849_v22  ;;  %v2590_v21 = vmov 6   ;;  %v2591_v22 = vmov 2  }
 0x153   : > { %2308 = vmatprep.subr.mxu0 %v2586_v9  ;;  %2327 = vmatprep.subr.mxu1 %v2586_v9 }
 0x154   : > { %2309 = vmatpush3.msra.mxu0 %v767_v23  ;;  %2328 = vmatpush3.msra.mxu1 %v848_v24  ;;  %v2592_v24 = vmov 3  }
 0x155   : > { %2310 = vmatprep.subr.mxu0 %v2586_v9  ;;  %2329 = vmatprep.subr.mxu1 %v2586_v9 }
 0x156   : > { %2311 = vmatpush3.msra.mxu0 %v766_v25  ;;  %2330 = vmatpush3.msra.mxu1 %v847_v26  ;;  %v2593_v25 = vmov 4  }
 0x157   : > { %2312 = vmatprep.subr.mxu0 %v2586_v9  ;;  %2331 = vmatprep.subr.mxu1 %v2586_v9 }
 0x158   : > { %2313 = vmatpush3.msra.mxu0 %v765_v27  ;;  %2332 = vmatpush3.msra.mxu1 %v846_v28  ;;  %v2594_v27 = vmov 5   ;;  %v2595_v28 = vmov 7  }
 0x159   : > { %2314 = vmatprep.subr.mxu0 %v2586_v9  ;;  %2333 = vmatprep.subr.mxu1 %v2586_v9 }
 0x15a   : > { %2315 = vmatpush3.msra.mxu0 %v764_v29  ;;  %2334 = vmatpush3.msra.mxu1 %v845_v30  ;;  %v2191_v29 = vld [vmem:[%s3117_s9] ss:$0 sm:$0xff] }
 0x15b   : > { %2316 = vmatprep.subr.mxu0 %v2586_v9  ;;  %2335 = vmatprep.subr.mxu1 %v2586_v9 }
 0x15c   : > { %2317 = vmatpush3.msra.mxu0 %v763_v31  ;;  %2336 = vmatpush3.msra.mxu1 %v844_v32 }
 0x15d   : > { %2318 = vmatprep.subr.mxu0 %v2586_v9  ;;  %2337 = vmatprep.subr.mxu1 %v2586_v9 }
 0x15e   : > { %2319 = vmatpush3.msra.mxu0 %v762_v33  ;;  %2338 = vmatpush3.msra.mxu1 %v843_v34  ;;  %v1488_v33 = vld [vmem:[%s3120_s12 + $0x38] sm:$0xff]  ;;  %v1487_v34 = vld [vmem:[%s3120_s12 + $0x30] sm:$0xff] }
 0x15f   : > { %2320 = vmatprep.subr.mxu0 %v2586_v9  ;;  %2339 = vmatprep.subr.mxu1 %v2586_v9 }
 0x160   : > { %2321 = vmatpush3.msra.mxu0 %v761_v35  ;;  %2340 = vmatpush3.msra.mxu1 %v842_v36  ;;  %v1486_v36 = vld [vmem:[%s3120_s12 + $0x28] sm:$0xff] }
 0x161   : > { %2344 = vmatprep.subr.mxu0 %v2586_v9  ;;  %2363 = vmatprep.subr.mxu1 %v2586_v9 }
 0x210   : > { %v633_v37 = vpop.f32.mrf.mxu0  ;;  %v2861_v38 = vpop.f32.mrf.mxu1 }
 0x211   : > { %714 = vst.msk [vmem:[#allocation2 + $0x3] sm:$0xff] %vm713_vm3, %v633_v37 }
 0x212   : > { %v2294_v39 = vpop.f32.mrf.mxu0  ;;  %v2305_v40 = vpop.f32.mrf.mxu1 }
 0x213   : > { %v1485_v39 = vld [vmem:[%s3120_s12 + $0x20] sm:$0xff] }
 0x218   : > { %v723_v44 = vld [vmem:[#allocation2] sm:$0xff] }
 0x219   : > { %v731_v45 = vld [vmem:[#allocation2 + $0x1] sm:$0xff]  ;;  %v729_v46 = vmul.f32 %v2184_v41, %v723_v44  ;;  %v1484_v41 = vld [vmem:[%s3120_s12 + $0x18] sm:$0xff] }
 0x21a   : > { %v739_v47 = vld [vmem:[#allocation2 + $0x2] sm:$0xff]  ;;  %v737_v50 = vmul.f32 %v2185_v42, %v731_v45  ;;  %v1483_v42 = vld [vmem:[%s3120_s12 + $0x10] sm:$0xff] }
 0x21b   : > { %v730_v49 = vadd.f32 %v2183_v43, %v729_v46  ;;  %v747_v51 = vld [vmem:[#allocation2 + $0x3] sm:$0xff]  ;;  %v745_v54 = vmul.f32 %v2186_v48, %v739_v47 }
 0x21c   : > { %v753_v56 = vmul.f32 %v2187_v52, %v747_v51  ;;  %v1482_v43 = vld [vmem:[%s3120_s12 + $0x8] sm:$0xff]  ;;  %v1481_v44 = vld [vmem:[%s3120_s12] sm:$0xff] }
 0x21d   : > { %v738_v53 = vadd.f32 %v737_v50, %v730_v49  ;;  %v1093_v47 = vld [vmem:[%s3118_s10] sm:$0xff] }
 0x21e   : > { %v1094_v48 = vmul.f32 1.442695, %v1093_v47 }
 0x21f   : > { %v746_v55 = vadd.f32 %v745_v54, %v738_v53 }
 0x221   : > { %v754_v57 = vadd.f32 %v753_v56, %v746_v55 }
 0x223   : > { %v755_v58 = vsub.f32 0.0, %v754_v57 }
 0x225   : > { %v756_v59 = vmul.f32 1.442695, %v755_v58 }
 0x227   : > { %2484 = vpow2.f32 %v756_v59 }
 0x234   : > { %v2485_v60 = vpop.eup %2484 }
 0x235   : > { %v758_v61 = vadd.f32 1.0, %v2485_v60 }
 0x237   : > { %2486 = vrcp.f32 %v758_v61 }
 0x244   : > { %v2487_v62 = vpop.eup %2486 }
 0x245   : > { %v2879_v63 = vmul.f32 %v2487_v62, %v754_v57 }
 0x247   : > { %2323 = vmatmul.mubr.msk.f32.vlgmr.msra.gmra.mxu0 %vm713_vm3, %v2879_v63  ;;  %2342 = vmatmul.mubr.msk.f32.vlgmr.msra.gmra.mxu1 %vm713_vm3, %v2879_v63 }
 0x248   : > { %2345 = vmatpush3.msra.mxu0 %v927_v1  ;;  %2360 = vmatprep.mubr.msk.f32.mxu0 %vm2587_vm1, %v2586_v9 }
 0x249   : > { %2346 = vmatprep.subr.mxu0 %v2586_v9  ;;  %2365 = vmatprep.mubr.msk.f32.mxu1 %vm2587_vm1, %v2586_v9 }
 0x24a   : > { %2347 = vmatpush3.msra.mxu0 %v926_v2  ;;  %2364 = vmatpush3.msk.msra.mxu1 %vm1010_vm4, %v998_v10 }
 0x24b   : > { %2348 = vmatprep.subr.mxu0 %v2586_v9  ;;  %2368 = vmatprep.subr.mxu1 %v2586_v9 }
 0x24c   : > { %2349 = vmatpush3.msra.mxu0 %v925_v3 }
 0x24d   : > { %2350 = vmatprep.subr.mxu0 %v2586_v9 }
 0x24e   : > { %2351 = vmatpush3.msra.mxu0 %v924_v4 }
 0x24f   : > { %2352 = vmatprep.subr.mxu0 %v2586_v9 }
 0x250   : > { %2353 = vmatpush3.msra.mxu0 %v923_v5 }
 0x251   : > { %2354 = vmatprep.subr.mxu0 %v2586_v9 }
 0x252   : > { %2355 = vmatpush3.msra.mxu0 %v922_v6 }
 0x253   : > { %2356 = vmatprep.subr.mxu0 %v2586_v9 }
 0x254   : > { %2357 = vmatpush3.msra.mxu0 %v921_v7 }
 0x255   : > { %2358 = vmatprep.subr.mxu0 %v2586_v9 }
 0x256   : > { %2359 = vmatpush3.msra.mxu0 %v920_v8 }
 0x257   : > { %2361 = vmatmul.mubr.msk.f32.vlgmr.msra.gmra.mxu0 %vm713_vm3, %v2879_v63  ;;  %2387 = vmatprep.subr.mxu0 %v2586_v9 }
 0x258   : > { %2389 = vmatprep.mubr.msk.f32.mxu0 %vm2587_vm1, %v2586_v9 }
 0x307   : > { %v838_v12 = vpop.f32.mrf.mxu0  ;;  %v916_v13 = vpop.f32.mrf.mxu1 }
 0x308   : > { %1100 = vxpose.xlu1.b32.start.end [1/1] (short) (narrow) %v916_v13, 8  ;;  %2366 = vmatmul.mubr.msk.f32.vlgmr.msra.gmra.mxu1 %vm1006_vm5, %v838_v12 }
 0x309   : > { %v2324_v14 = vpop.f32.mrf.mxu0  ;;  %v2343_v15 = vpop.f32.mrf.mxu1  ;;  %2384 = vmatprep.mubr.msk.f32.mxu1 %vm2587_vm1, %v2586_v9  ;;  %2369 = vmatpush3.msra.mxu1 %v1488_v33 }
 0x30a   : > { %2370 = vmatprep.subr.mxu1 %v2586_v9 }
 0x30b   : > { %2371 = vmatpush3.msra.mxu1 %v1487_v34 }
 0x30c   : > { %2372 = vmatprep.subr.mxu1 %v2586_v9 }
 0x30d   : > { %2373 = vmatpush3.msra.mxu1 %v1486_v36 }
 0x30e   : > { %2374 = vmatprep.subr.mxu1 %v2586_v9 }
 0x30f   : > { %2375 = vmatpush3.msra.mxu1 %v1485_v39 }
 0x310   : > { %2376 = vmatprep.subr.mxu1 %v2586_v9 }
 0x311   : > { %2377 = vmatpush3.msra.mxu1 %v1484_v41 }
 0x312   : > { %2378 = vmatprep.subr.mxu1 %v2586_v9 }
 0x313   : > { %2379 = vmatpush3.msra.mxu1 %v1483_v42 }
 0x314   : > { %2380 = vmatprep.subr.mxu1 %v2586_v9 }
 0x315   : > { %2381 = vmatpush3.msra.mxu1 %v1482_v43 }
 0x316   : > { %2382 = vmatprep.subr.mxu1 %v2586_v9 }
 0x317   : > { %v994_v16 = vpop.f32.mrf.mxu0  ;;  %2383 = vmatpush3.msra.mxu1 %v1481_v44 }
 0x318   : > { %1134 = vxpose.xlu1.b32.start.end [1/1] (short) (narrow) %v994_v16, 8  ;;  %2397 = vmatprep.subr.mxu1 %v2586_v9 }
 0x319   : > { %v2362_v17 = vpop.f32.mrf.mxu0 }
 0x336   : > { %2467 = vset.pattern.permute.xlu1 %v2589_v18 }
 0x384   : > { %v1116_v19 = vpop.trf.xlu1 }
 0x385   : > { %1133 = vst.msk [vmem:[#allocation5] sm:$0xff] %vm1132_vm6, %v1116_v19 }
 0x38c   : > { %v1169_v20 = vld [vmem:[#allocation5] sm:$0xff] }
 0x38d   : > { %1181 = vperm.xlu0 %2466, %v1169_v20   ;;  %1219 = vperm.xlu1 %2467, %v1169_v20  }
 0x391   : > { %2472 = vset.pattern.permute.xlu0 %v2590_v21  ;;  %2468 = vset.pattern.permute.xlu1 %v2591_v22 }
 0x392   : > { %1404 = vperm.xlu0 %2472, %v1169_v20   ;;  %1256 = vperm.xlu1 %2468, %v1169_v20  }
 0x394   : > { %v1150_v23 = vpop.trf.xlu1 }
 0x395   : > { %1166 = vst.msk [vmem:[#allocation6] sm:$0xff] %vm1132_vm6, %v1150_v23 }
 0x396   : > { %2469 = vset.pattern.permute.xlu1 %v2592_v24  ;;  %2475 = vset.pattern.permute.xlu0 %v2589_v18 }
 0x397   : > { %1293 = vperm.xlu1 %2469, %v1169_v20  }
 0x39b   : > { %2470 = vset.pattern.permute.xlu1 %v2593_v25 }
 0x39c   : > { %1330 = vperm.xlu1 %2470, %v1169_v20   ;;  %v1208_v26 = vld [vmem:[#allocation6] sm:$0xff] }
 0x39d   : > { %1230 = vperm.xlu0 %2475, %v1208_v26  }
 0x3a0   : > { %2471 = vset.pattern.permute.xlu1 %v2594_v27 }
 0x3a1   : > { %1367 = vperm.xlu1 %2471, %v1169_v20   ;;  %2478 = vset.pattern.permute.xlu0 %v2593_v25 }
 0x3a2   : > { %1341 = vperm.xlu0 %2478, %v1208_v26  }
 0x3a5   : > { %2473 = vset.pattern.permute.xlu1 %v2595_v28 }
 0x3a6   : > { %1441 = vperm.xlu1 %2473, %v1169_v20   ;;  %2481 = vset.pattern.permute.xlu0 %v2595_v28 }
 0x3a7   : > { %1452 = vperm.xlu0 %2481, %v1208_v26  }
 0x3aa   : > { %2474 = vset.pattern.permute.xlu1 %v2588_v11 }
 0x3ab   : > { %1192 = vperm.xlu1 %2474, %v1208_v26  }
 0x3af   : > { %2476 = vset.pattern.permute.xlu1 %v2591_v22 }
 0x3b0   : > { %1267 = vperm.xlu1 %2476, %v1208_v26  }
 0x3b4   : > { %2477 = vset.pattern.permute.xlu1 %v2592_v24 }
 0x3b5   : > { %1304 = vperm.xlu1 %2477, %v1208_v26  }
 0x3b9   : > { %2479 = vset.pattern.permute.xlu1 %v2594_v27 }
 0x3ba   : > { %1378 = vperm.xlu1 %2479, %v1208_v26  }
 0x3be   : > { %2480 = vset.pattern.permute.xlu1 %v2590_v21 }
 0x3bf   : > { %1415 = vperm.xlu1 %2480, %v1208_v26  }
 0x3c8   : > { %v1080_v30 = vpop.f32.mrf.mxu1 }
 0x3c9   : > { %v1081_v31 = vadd.f32 %v2191_v29, %v1080_v30 }
 0x3ca   : > { %v2367_v32 = vpop.f32.mrf.mxu1 }
 0x3cb   : > { %v1085_v35 = vand.u32 2147483647, %v1081_v31  ;;  %v1084_v50 = vmax.f32 %v1081_v31, 0.0 }
 0x3cd   : > { %v1086_v37 = vsub.f32 0.0, %v1085_v35 }
 0x3cf   : > { %v1087_v40 = vmul.f32 1.442695, %v1086_v37 }
 0x3d1   : > { %2488 = vpow2.f32 %v1087_v40 }
 0x3de   : > { %v2489_v45 = vpop.eup %2488 }
 0x3df   : > { %v1089_v46 = vadd.f32 1.0, %v2489_v45 }
 0x3e1   : > { %2490 = vlog2.f32 %v1089_v46 }
 0x3e2   : > { %2492 = vpow2.f32 %v1094_v48 }
 0x3ee   : > { %v2491_v49 = vpop.eup %2490 }
 0x3ef   : > { %v1091_v51 = vmul.f32 0.6931472, %v2491_v49  ;;  %v2493_v54 = vpop.eup %2492 }
 0x3f0   : > { %v1096_v55 = vsub.f32 0.0, %v2493_v54 }
 0x3f1   : > { %v1092_v52 = vadd.f32 %v1091_v51, %v1084_v50 }
 0x3f3   : > { %1097 = vst.msk [vmem:[#allocation3] sm:$0xff] %vm713_vm3, %v1092_v52  ;;  %v1098_v53 = vmul.f32 %v1092_v52, %v2879_v63 }
 0x3f5   : > { %1099 = vst.msk [vmem:[#allocation4] sm:$0xff] %vm713_vm3, %v1098_v53 }
 0x3fa   : > { %v2194_v56 = vld [vmem:[#allocation3] ss:$0 sm:$0xff]  ;;  %v2196_v57 = vld [vmem:[#allocation3 + $0x1] ss:$0 sm:$0xff]  ;;  %v2198_v60 = vld [vmem:[#allocation3 + $0x2] ss:$0 sm:$0xff] }
 0x3fb   : > { %v1175_v58 = vmul.f32 %v2194_v56, %v1096_v55  ;;  %v1213_v59 = vmul.f32 %v2196_v57, %v1096_v55  ;;  %v1250_v1 = vmul.f32 %v2198_v60, %v1096_v55  ;;  %v2200_v2 = vld [vmem:[#allocation3 + $0x3] ss:$0 sm:$0xff]  ;;  %v2202_v5 = vld [vmem:[#allocation3 + $0x4] ss:$0 sm:$0xff]  ;;  %v2204_v10 = vld [vmem:[#allocation3 + $0x5] ss:$0 sm:$0xff] }
 0x3fc   : > { %v1287_v4 = vmul.f32 %v2200_v2, %v1096_v55  ;;  %v1324_v7 = vmul.f32 %v2202_v5, %v1096_v55  ;;  %v1361_v13 = vmul.f32 %v2204_v10, %v1096_v55  ;;  %v2195_v15 = vld [vmem:[#allocation4] ss:$0 sm:$0xff]  ;;  %v2206_v16 = vld [vmem:[#allocation3 + $0x6] ss:$0 sm:$0xff]  ;;  %v2197_v24 = vld [vmem:[#allocation4 + $0x1] ss:$0 sm:$0xff] }
 0x3fd   : > { %v1176_v61 = vmul.f32 1.442695, %v1175_v58  ;;  %v1214_v62 = vmul.f32 1.442695, %v1213_v59  ;;  %v1251_v3 = vmul.f32 1.442695, %v1250_v1  ;;  %v1398_v22 = vmul.f32 %v2206_v16, %v1096_v55 }
 0x3fe   : > { %v1288_v6 = vmul.f32 1.442695, %v1287_v4  ;;  %v1325_v12 = vmul.f32 1.442695, %v1324_v7  ;;  %v1362_v21 = vmul.f32 1.442695, %v1361_v13 }
 0x3ff   : > { %2494 = vpow2.f32 %v1176_v61  ;;  %v2208_v25 = vld [vmem:[#allocation3 + $0x7] ss:$0 sm:$0xff]  ;;  %v1399_v30 = vmul.f32 1.442695, %v1398_v22  ;;  %v2199_v34 = vld [vmem:[#allocation4 + $0x2] ss:$0 sm:$0xff] }
 0x400   : > { %2496 = vpow2.f32 %v1214_v62  ;;  %v1435_v31 = vmul.f32 %v2208_v25, %v1096_v55  ;;  %v2201_v42 = vld [vmem:[#allocation4 + $0x3] ss:$0 sm:$0xff]  ;;  %v2203_v51 = vld [vmem:[#allocation4 + $0x4] ss:$0 sm:$0xff]  ;;  %v2205_v60 = vld [vmem:[#allocation4 + $0x5] ss:$0 sm:$0xff] }
 0x401   : > { %2498 = vpow2.f32 %v1251_v3  ;;  %v2207_v7 = vld [vmem:[#allocation4 + $0x6] ss:$0 sm:$0xff]  ;;  %v1474_v13 = vsub.f32 0.0, %v2861_v38  ;;  %v2209_v22 = vld [vmem:[#allocation4 + $0x7] ss:$0 sm:$0xff] }
 0x402   : > { %2500 = vpow2.f32 %v1288_v6  ;;  %v1436_v40 = vmul.f32 1.442695, %v1435_v31 }
 0x403   : > { %2502 = vpow2.f32 %v1325_v12 }
 0x404   : > { %2504 = vpow2.f32 %v1362_v21 }
 0x405   : > { %2506 = vpow2.f32 %v1399_v30 }
 0x406   : > { %2508 = vpow2.f32 %v1436_v40 }
 0x408   : > { %v1220_v8 = vpop.permute.xlu1 %1219  ;;  %v1182_v11 = vpop.permute.xlu0 %1181 }
 0x409   : > { %v1188_v18 = vmul.f32 %v2195_v15, %v1182_v11  ;;  %v1226_v27 = vmul.f32 %v2197_v24, %v1220_v8 }
 0x40c   : > { %v2495_v14 = vpop.eup %2494 }
 0x40d   : > { %v1178_v17 = vmul.f32 0.0, %v2495_v14  ;;  %v1257_v19 = vpop.permute.xlu1 %1256  ;;  %v2497_v23 = vpop.eup %2496 }
 0x40e   : > { %v2499_v32 = vpop.eup %2498  ;;  %v1405_v33 = vpop.permute.xlu0 %1404  ;;  %v1263_v36 = vmul.f32 %v2199_v34, %v1257_v19 }
 0x40f   : > { %v2974_v20 = vadd.f32 %v1188_v18, %v1178_v17  ;;  %v2501_v41 = vpop.eup %2500  ;;  %v1411_v11 = vmul.f32 %v2207_v7, %v1405_v33 }
 0x410   : > { %v2503_v49 = vpop.eup %2502 }
 0x411   : > { %v1216_v26 = vmul.f32 %v2497_v23, %v2974_v20  ;;  %v2505_v58 = vpop.eup %2504 }
 0x412   : > { %v1294_v28 = vpop.permute.xlu1 %1293  ;;  %v2507_v6 = vpop.eup %2506 }
 0x413   : > { %v1227_v29 = vadd.f32 %v1226_v27, %v1216_v26  ;;  %v1300_v45 = vmul.f32 %v2201_v42, %v1294_v28  ;;  %v2509_v19 = vpop.eup %2508  ;;  %v1475_v26 = vmul.f32 1.442695, %v1474_v13 }
 0x415   : > { %v1253_v35 = vmul.f32 %v2499_v32, %v1227_v29  ;;  %2510 = vpow2.f32 %v1475_v26 }
 0x417   : > { %v1264_v37 = vadd.f32 %v1263_v36, %v1253_v35  ;;  %v1331_v39 = vpop.permute.xlu1 %1330 }
 0x418   : > { %v1231_v43 = vpop.permute.xlu0 %1230  ;;  %v1337_v54 = vmul.f32 %v2203_v51, %v1331_v39 }
 0x419   : > { %v1290_v44 = vmul.f32 %v2501_v41, %v1264_v37  ;;  %v1233_v46 = vmul.f32 %v1231_v43, %v1227_v29 }
 0x41b   : > { %v2977_v47 = vadd.f32 %v1300_v45, %v1290_v44  ;;  %v1234_v48 = vsel %vm713_vm3, %v1233_v46, 0.0 }
 0x41c   : > { %v1235_v50 = vrot.slane %v1234_v48, 4  ;;  %v1368_v52 = vpop.permute.xlu1 %1367 }
 0x41d   : > { %v1327_v53 = vmul.f32 %v2503_v49, %v2977_v47  ;;  %v1342_v56 = vpop.permute.xlu0 %1341  ;;  %v1374_v62 = vmul.f32 %v2205_v60, %v1368_v52 }
 0x41e   : > { %v1236_v55 = vadd.f32 %v1235_v50, %v1234_v48 }
 0x41f   : > { %v1338_v57 = vadd.f32 %v1337_v54, %v1327_v53 }
 0x420   : > { %v1237_v59 = vrot.slane %v1236_v55, 2 }
 0x421   : > { %v1364_v61 = vmul.f32 %v2505_v58, %v1338_v57  ;;  %v1344_v1 = vmul.f32 %v1342_v56, %v1338_v57  ;;  %v1442_v2 = vpop.permute.xlu1 %1441 }
 0x422   : > { %v1238_v3 = vadd.f32 %v1237_v59, %v1236_v55  ;;  %v1448_v23 = vmul.f32 %v2209_v22, %v1442_v2  ;;  %v1453_v32 = vpop.permute.xlu0 %1452 }
 0x423   : > { %v1375_v4 = vadd.f32 %v1374_v62, %v1364_v61  ;;  %v1345_v5 = vsel %vm713_vm3, %v1344_v1, 0.0 }
 0x424   : > { %v1239_v8 = vrot.slane %v1238_v3, 1  ;;  %v1346_v10 = vrot.slane %v1345_v5, 4 }
 0x425   : > { %v1401_v12 = vmul.f32 %v2507_v6, %v1375_v4  ;;  %v2511_v6 = vpop.eup %2510 }
 0x426   : > { %v1240_v14 = vadd.f32 %v1239_v8, %v1238_v3  ;;  %v1347_v15 = vadd.f32 %v1346_v10, %v1345_v5  ;;  %v1193_v16 = vpop.permute.xlu1 %1192 }
 0x427   : > { %v1412_v17 = vadd.f32 %v1411_v11, %v1401_v12  ;;  %v1195_v18 = vmul.f32 %v1193_v16, %v2974_v20  ;;  %v1477_v12 = vadd.f32 1.0, %v2511_v6  ;;  %v2597_v6 = vmov 2475754826  }
 0x428   : > { %1241 = vst.msk [vmem:[#allocation7 + $0x1] sm:$0x1] %vm1203_vm7, %v1240_v14  ;;  %v1348_v21 = vrot.slane %v1347_v15, 2 }
 0x429   : > { %v1438_v24 = vmul.f32 %v2509_v19, %v1412_v17  ;;  %v1196_v25 = vsel %vm713_vm3, %v1195_v18, 0.0  ;;  %2512 = vrcp.f32 %v1477_v12  ;;  %v2599_v12 = vmov 2102212464  }
 0x42a   : > { %v1349_v27 = vadd.f32 %v1348_v21, %v1347_v15  ;;  %v1197_v28 = vrot.slane %v1196_v25, 4 }
 0x42b   : > { %v1449_v29 = vadd.f32 %v1448_v23, %v1438_v24  ;;  %v1268_v30 = vpop.permute.xlu1 %1267  ;;  %v2210_v24 = vld [vmem:[%s3119_s11] ss:$0 sm:$0xff] }
 0x42c   : > { %v1350_v31 = vrot.slane %v1349_v27, 1  ;;  %v1198_v33 = vadd.f32 %v1197_v28, %v1196_v25  ;;  %v1270_v34 = vmul.f32 %v1268_v30, %v1264_v37  ;;  %v1472_v26 = vmul.f32 %v2210_v24, %v2879_v63 }
 0x42d   : > { %v1455_v35 = vmul.f32 %v1453_v32, %v1449_v29 }
 0x42e   : > { %v1351_v20 = vadd.f32 %v1350_v31, %v1349_v27  ;;  %v1199_v36 = vrot.slane %v1198_v33, 2  ;;  %v1271_v39 = vsel %vm713_vm3, %v1270_v34, 0.0 }
 0x42f   : > { %v1456_v40 = vsel %vm713_vm3, %v1455_v35, 0.0  ;;  %v1272_v41 = vrot.slane %v1271_v39, 4 }
 0x430   : > { %1352 = vst.msk [vmem:[#allocation7 + $0x4] sm:$0x1] %vm1203_vm7, %v1351_v20  ;;  %v1457_v42 = vrot.slane %v1456_v40, 4  ;;  %v1200_v43 = vadd.f32 %v1199_v36, %v1198_v33  ;;  %v1305_v44 = vpop.permute.xlu1 %1304 }
 0x431   : > { %v1273_v45 = vadd.f32 %v1272_v41, %v1271_v39  ;;  %v1307_v46 = vmul.f32 %v1305_v44, %v2977_v47  ;;  %v3027_v44 = vld [vmem:[%s3122_s14] sm:$0xff] }
 0x432   : > { %v1458_v48 = vadd.f32 %v1457_v42, %v1456_v40  ;;  %v1201_v49 = vrot.slane %v1200_v43, 1 }
 0x433   : > { %v1274_v37 = vrot.slane %v1273_v45, 2  ;;  %v1308_v50 = vsel %vm713_vm3, %v1307_v46, 0.0 }
 0x434   : > { %v1459_v51 = vrot.slane %v1458_v48, 2  ;;  %v1202_v52 = vadd.f32 %v1201_v49, %v1200_v43  ;;  %v1309_v53 = vrot.slane %v1308_v50, 4  ;;  %v3017_v43 = vld [vmem:[%s3121_s13] sm:$0xff] }
 0x435   : > { %v1275_v54 = vadd.f32 %v1274_v37, %v1273_v45  ;;  %v1379_v55 = vpop.permute.xlu1 %1378  ;;  %v1724_v45 = vld [vmem:[%s3123_s15] sm:$0xff] }
 0x436   : > { %v1460_v56 = vadd.f32 %v1459_v51, %v1458_v48  ;;  %1204 = vst.msk [vmem:[#allocation7] sm:$0x1] %vm1203_vm7, %v1202_v52  ;;  %v1310_v57 = vadd.f32 %v1309_v53, %v1308_v50  ;;  %v1381_v58 = vmul.f32 %v1379_v55, %v1375_v4  ;;  %v2513_v25 = vpop.eup %2512  ;;  %v1725_v49 = vld [vmem:[%s3124_s16] sm:$0xff] }
 0x437   : > { %v1276_v59 = vrot.slane %v1275_v54, 1  ;;  %v1479_v28 = vmul.f32 %v2513_v25, %v2861_v38 }
 0x438   : > { %v1461_v60 = vrot.slane %v1460_v56, 1  ;;  %v1311_v61 = vrot.slane %v1310_v57, 2  ;;  %v1382_v47 = vsel %vm713_vm3, %v1381_v58, 0.0 }
 0x439   : > { %v1277_v62 = vadd.f32 %v1276_v59, %v1275_v54  ;;  %v1383_v1 = vrot.slane %v1382_v47, 4 }
 0x43a   : > { %v1462_v2 = vadd.f32 %v1461_v60, %v1460_v56  ;;  %v1312_v3 = vadd.f32 %v1311_v61, %v1310_v57  ;;  %v1416_v5 = vpop.permute.xlu1 %1415 }
 0x43b   : > { %1278 = vst.msk [vmem:[#allocation7 + $0x2] sm:$0x1] %vm1203_vm7, %v1277_v62  ;;  %v1384_v7 = vadd.f32 %v1383_v1, %v1382_v47  ;;  %v1418_v8 = vmul.f32 %v1416_v5, %v1412_v17 }
 0x43c   : > { %1463 = vst.msk [vmem:[#allocation7 + $0x7] sm:$0x1] %vm1203_vm7, %v1462_v2  ;;  %v1313_v10 = vrot.slane %v1312_v3, 1 }
 0x43d   : > { %v1385_v11 = vrot.slane %v1384_v7, 2  ;;  %v1419_v4 = vsel %vm713_vm3, %v1418_v8, 0.0 }
 0x43e   : > { %v1314_v13 = vadd.f32 %v1313_v10, %v1312_v3  ;;  %v1420_v14 = vrot.slane %v1419_v4, 4  ;;  %v2596_v3 = vmov 683565275   ;;  %v2598_v10 = vmov 2131351028  }
 0x43f   : > { %v1386_v15 = vadd.f32 %v1385_v11, %v1384_v7 }
 0x440   : > { %1315 = vst.msk [vmem:[#allocation7 + $0x3] sm:$0x1] %vm1203_vm7, %v1314_v13  ;;  %v1421_v16 = vadd.f32 %v1420_v14, %v1419_v4 }
 0x441   : > { %v1387_v18 = vrot.slane %v1386_v15, 1 }
 0x442   : > { %v1422_v19 = vrot.slane %v1421_v16, 2 }
 0x443   : > { %v1388_v21 = vadd.f32 %v1387_v18, %v1386_v15  ;;  %v2600_v15 = vmov 920167782  }
 0x444   : > { %v1423_v22 = vadd.f32 %v1422_v19, %v1421_v16  ;;  %v2601_v19 = vmov 1326507024  }
 0x445   : > { %1389 = vst.msk [vmem:[#allocation7 + $0x5] sm:$0x1] %vm1203_vm7, %v1388_v21 }
 0x446   : > { %v1424_v17 = vrot.slane %v1423_v22, 1 }
 0x448   : > { %v1425_v23 = vadd.f32 %v1424_v17, %v1423_v22 }
 0x44a   : > { %1426 = vst.msk [vmem:[#allocation7 + $0x6] sm:$0x1] %vm1203_vm7, %v1425_v23 }
 0x451   : > { %v1464_v27 = vld [vmem:[#allocation7] sm:$0xff] }
 0x452   : > { %v1473_v29 = vadd.f32 %v1472_v26, %v1464_v27 }
 0x454   : > { %v1480_v30 = vmul.f32 %v1479_v28, %v1473_v29 }
 0x456   : > { %2385 = vmatmul.mubr.msk.f32.vlgmr.msra.gmra.mxu1 %vm713_vm3, %v1480_v30 }
 0x457   : > { %2399 = vmatprep.mubr.msk.f32.mxu1 %vm2587_vm1, %v2586_v9 }
 0x516   : > { %v1558_v31 = vpop.f32.mrf.mxu1 }
 0x517   : > { %v3008_v32 = vadd.f32 %v1558_v31, %v2746_v0 }
 0x518   : > { %v2386_v33 = vpop.f32.mrf.mxu1 }
 0x519   : > { %v1563_v34 = vsel %vm545_vm0, %v3008_v32, 0.0 }
 0x51a   : > { %1564 = vadd.xlane.f32.xlu1 %v1563_v34 }
 0x5a3   : > { %v1565_v63 = vpop.xlane.xlu1 %1564 }
 0x5a4   : > { %v1566_v35 = vmul.f32 0.03125, %v1565_v63 }
 0x5a6   : > { %v1567_v38 = vsub.f32 %v3008_v32, %v1566_v35 }
 0x5a8   : > { %v1568_v20 = vmul.f32 %v1567_v38, %v1567_v38 }
 0x5aa   : > { %v1569_v36 = vsel %vm545_vm0, %v1568_v20, 0.0 }
 0x5ab   : > { %1570 = vadd.xlane.f32.xlu0 %v1569_v36 }
 0x634   : > { %v1571_v39 = vpop.xlane.xlu0 %1570 }
 0x635   : > { %v1572_v40 = vmul.f32 0.03125, %v1571_v39 }
 0x637   : > { %v1573_v41 = vadd.f32 1e-05, %v1572_v40 }
 0x639   : > { %2514 = vrsqrt.f32 %v1573_v41 }
 0x646   : > { %v2515_v42 = vpop.eup %2514 }
 0x647   : > { %v1575_v0 = vmul.f32 %v2515_v42, %v1567_v38 }
 0x649   : > { %2388 = vmatpush3.msra.mxu0 %v1575_v0 }
 0x64a   : > { %2390 = vmatmul.mubr.msk.f32.vlgmr.msra.gmra.mxu0 %vm1132_vm6, %v3017_v43  ;;  %2392 = vmatprep.subr.mxu0 %v2586_v9 }
 0x64b   : > { %2393 = vmatpush3.msra.mxu0 %v1575_v0  ;;  %2394 = vmatprep.mubr.msk.f32.mxu0 %vm2587_vm1, %v2586_v9 }
 0x64c   : > { %2402 = vmatprep.subr.mxu0 %v2586_v9 }
 0x64e   : > { %2395 = vmatmul.mubr.msk.f32.vlgmr.msra.gmra.mxu0 %vm1132_vm6, %v3027_v44 }
 0x64f   : > { %2404 = vmatprep.mubr.msk.f32.mxu0 %vm2587_vm1, %v2586_v9 }
 0x70a   : > { %v1647_v46 = vpop.f32.mrf.mxu0 }
 0x70b   : > { %v1726_v48 = vmul.f32 %v1724_v45, %v1647_v46  ;;  %v1729_v51 = vmul.f32 %v1725_v49, %v1647_v46 }
 0x70c   : > { %v2391_v37 = vpop.f32.mrf.mxu0 }
 0x70e   : > { %v1720_v50 = vpop.f32.mrf.mxu0 }
 0x70f   : > { %v1727_v52 = vmul.f32 %v1725_v49, %v1720_v50  ;;  %v1730_v53 = vmul.f32 %v1724_v45, %v1720_v50 }
 0x710   : > { %v2396_v54 = vpop.f32.mrf.mxu0 }
 0x711   : > { %v3040_v55 = vsub.f32 %v1726_v48, %v1727_v52  ;;  %v3042_v56 = vadd.f32 %v1730_v53, %v1729_v51 }
 0x713   : > { %v1738_v9 = vand.u32 2139095040, %v3042_v56  ;;  %v1735_v60 = vand.u32 2147483647, %v3042_v56  ;;  %vm1737_vm15 = vcmp.lt.s32.totalorder %v3042_v56, 0 }
 0x715   : > { %v1739_v57 = vshrl.u32 %v1738_v9, 23  ;;  %v1742_v62 = vand.u32 8388607, %v1735_v60  ;;  %vm1736_vm1 = vcmp.le.f32.partialorder %v1735_v60, 0.7853982 }
 0x717   : > { %v2214_v58 = vadd.s32 4294967169, %v1739_v57  ;;  %v1743_v22 = vor.u32 8388608, %v1742_v62 }
 0x719   : > { %v1745_v59 = vadd.s32 1, %v2214_v58  ;;  %v1783_v35 = vshll.u32 %v1743_v22, 8 }
 0x71b   : > { %vm1746_vm8 = vcmp.gt.s32.totalorder %v1745_v59, 0 }
 0x71c   : > { %v1747_v61 = vsel %vm1746_vm8, %v1745_v59, 0 }
 0x71d   : > { %v1749_v47 = vand.u32 31, %v1747_v61  ;;  %v1748_v2 = vshrl.u32 %v1747_v61, 5 }
 0x71f   : > { %v1750_v1 = vsub.s32 32, %v1749_v47  ;;  %v1752_v5 = vshll.u32 %v2596_v3, %v1749_v47  ;;  %v1755_v7 = vshll.u32 %v2597_v6, %v1749_v47  ;;  %v1758_v4 = vshll.u32 %v2598_v10, %v1749_v47 }
 0x720   : > { %v1761_v14 = vshll.u32 %v2599_v12, %v1749_v47  ;;  %v1764_v18 = vshll.u32 %v2600_v15, %v1749_v47  ;;  %vm1767_vm9 = vcmp.lt.s32.totalorder %v1748_v2, 1  ;;  %vm1770_vm10 = vcmp.lt.s32.totalorder %v1748_v2, 4 }
 0x721   : > { %v1753_v8 = vshrl.u32 %v2597_v6, %v1750_v1  ;;  %v1756_v11 = vshrl.u32 %v2598_v10, %v1750_v1  ;;  %v1759_v13 = vshrl.u32 %v2599_v12, %v1750_v1  ;;  %v1762_v16 = vshrl.u32 %v2600_v15, %v1750_v1 }
 0x722   : > { %v1765_v21 = vshrl.u32 %v2601_v19, %v1750_v1  ;;  %v1751_v30 = vshrl.u32 %v2596_v3, %v1750_v1  ;;  %vm1769_vm11 = vcmp.lt.s32.totalorder %v1748_v2, 3  ;;  %vm1768_vm12 = vcmp.lt.s32.totalorder %v1748_v2, 2 }
 0x723   : > { %v1754_v17 = vor.u32 %v1753_v8, %v1752_v5  ;;  %v1757_v23 = vor.u32 %v1756_v11, %v1755_v7  ;;  %v1760_v24 = vor.u32 %v1759_v13, %v1758_v4  ;;  %v1763_v25 = vor.u32 %v1762_v16, %v1761_v14 }
 0x724   : > { %v1766_v26 = vor.u32 %v1765_v21, %v1764_v18  ;;  %v1732_v11 = vsub.f32 0.0, %v3040_v55 }
 0x725   : > { %v1772_v27 = vsel %vm1770_vm10, %v1760_v24, 2102212464  ;;  %v1775_v28 = vsel %vm1767_vm9, %v1754_v17, %v1757_v23  ;;  %v1779_v29 = vsel %vm1767_vm9, %v1757_v23, %v1760_v24  ;;  %v1776_v31 = vsel %vm1770_vm10, %v1763_v25, 920167782 }
 0x726   : > { %v1780_v33 = vsel %vm1770_vm10, %v1766_v26, 1326507024  ;;  %v1777_v34 = vsel %vm1769_vm11, %v1760_v24, %v1776_v31  ;;  %v1771_v38 = vsel %vm1767_vm9, %v1751_v30, %v1754_v17  ;;  %v1773_v20 = vsel %vm1769_vm11, %v1757_v23, %v1772_v27 }
 0x727   : > { %v1781_v63 = vsel %vm1769_vm11, %v1763_v25, %v1780_v33  ;;  %v1778_v36 = vsel %vm1768_vm12, %v1775_v28, %v1777_v34  ;;  %v1774_v45 = vsel %vm1768_vm12, %v1771_v38, %v1773_v20  ;;  %v1733_v14 = vmul.f32 1.442695, %v1732_v11 }
 0x728   : > { %v1782_v39 = vsel %vm1768_vm12, %v1779_v29, %v1781_v63  ;;  %v3051_v42 = vmul.u32.u64.low %v1783_v35, %v1778_v36  ;;  %v3052_v0 = vmul.u32.u64.high %v1783_v35, %v1778_v36, %v3051_v42  ;;  %v1790_v48 = vmul.u32 %v1783_v35, %v1774_v45 }
 0x729   : > { %v3048_v40 = vmul.u32.u64.low %v1783_v35, %v1782_v39  ;;  %v3049_v41 = vmul.u32.u64.high %v1783_v35, %v1782_v39, %v3048_v40  ;;  %vm1827_vm9 = vweird.f32 %v3042_v56 }
 0x72a   : > { %v1793_v46 = vadd.s32 1, %v3052_v0 }
 0x72b   : > { %vm1792_vm13 = vc.u32 %v3049_v41, %v3051_v42  ;;  %v1791_v61 = vadd.s32 %v3051_v42, %v3049_v41 }
 0x72c   : > { %v1794_v49 = vsel %vm1792_vm13, %v1793_v46, %v3052_v0 }
 0x72d   : > { %v1795_v37 = vadd.s32 %v1794_v49, %v1790_v48 }
 0x72f   : > { %v1796_v50 = vadd.s32 536870912, %v1795_v37 }
 0x731   : > { %v1797_v51 = vshrl.u32 %v1796_v50, 30 }
 0x733   : > { %v1798_v52 = vshll.u32 %v1797_v51, 30  ;;  %v1821_v13 = vsub.s32 4, %v1797_v51 }
 0x735   : > { %v1799_v53 = vsub.s32 %v1795_v37, %v1798_v52  ;;  %v1822_v18 = vsel %vm1737_vm15, %v1821_v13, %v1797_v51 }
 0x736   : > { %v1824_v19 = vsel %vm1736_vm1, 0, %v1822_v18 }
 0x737   : > { %v1801_v54 = vsub.s32 0, %v1799_v53  ;;  %v1934_v21 = vadd.s32 3, %v1824_v19  ;;  %v1828_v22 = vand.u32 3, %v1824_v19 }
 0x739   : > { %v2215_v9 = vmin.u32 %v1801_v54, %v1799_v53  ;;  %v1935_v17 = vand.u32 3, %v1934_v21  ;;  %vm1833_vm2 = vcmp.eq.s32.totalorder %v1828_v22, 2  ;;  %vm1830_vm4 = vcmp.eq.s32.totalorder %v1828_v22, 0 }
 0x73a   : > { %vm1829_vm7 = vcmp.lt.s32.totalorder %v1828_v22, 2 }
 0x73b   : > { %v1803_v57 = vclz %v2215_v9  ;;  %vm1940_vm3 = vcmp.eq.s32.totalorder %v1935_v17, 2  ;;  %vm1937_vm5 = vcmp.eq.s32.totalorder %v1935_v17, 0  ;;  %vm1936_vm8 = vcmp.lt.s32.totalorder %v1935_v17, 2 }
 0x73d   : > { %v2216_v58 = vadd.s32 4294967294, %v1803_v57 }
 0x73f   : > { %vm2217_vm14 = vcmp.lt.s32.totalorder %v2216_v58, 0 }
 0x740   : > { %v1806_v59 = vsel %vm2217_vm14, 0, %v2216_v58 }
 0x741   : > { %v1807_v47 = vsub.s32 32, %v1806_v59  ;;  %v1811_v62 = vsub.s32 4294967266, %v1806_v59  ;;  %v1808_v1 = vshll.u32 %v1799_v53, %v1806_v59 }
 0x743   : > { %v1809_v2 = vshrl.u32 %v1791_v61, %v1807_v47  ;;  %v1812_v3 = vadd.s32 127, %v1811_v62 }
 0x745   : > { %v1810_v5 = vor.u32 %v1809_v2, %v1808_v1  ;;  %v1813_v6 = vshll.u32 %v1812_v3, 23 }
 0x747   : > { %v1814_v7 = vor.u32 4788187, %v1813_v6  ;;  %v1817_v10 = vcvt.s32.f32 %v1810_v5 }
 0x749   : > { %v1815_v8 = vand.u32 2147483647, %v1814_v7 }
 0x74b   : > { %v1818_v4 = vmul.f32 %v1817_v10, %v1815_v8 }
 0x74d   : > { %v1819_v12 = vxor.u32 2147483648, %v1818_v4 }
 0x74f   : > { %v1820_v15 = vsel %vm1737_vm15, %v1819_v12, %v1818_v4 }
 0x750   : > { %v1823_v16 = vsel %vm1736_vm1, %v3042_v56, %v1820_v15 }
 0x751   : > { %2516 = vcosq.f32 %v1823_v16 }
 0x752   : > { %2518 = vsinq.f32 %v1823_v16 }
 0x753   : > { %2520 = vpow2.f32 %v1733_v14 }
 0x75e   : > { %v2517_v23 = vpop.eup %2516 }
 0x75f   : > { %v2519_v24 = vpop.eup %2518  ;;  %v1834_v25 = vxor.u32 2147483648, %v2517_v23 }
 0x760   : > { %v2521_v26 = vpop.eup %2520  ;;  %v1831_v27 = vxor.u32 2147483648, %v2519_v24 }
 0x761   : > { %v1835_v60 = vsel %vm1833_vm2, %v1834_v25, %v2519_v24  ;;  %v1942_v28 = vsel %vm1940_vm3, %v1834_v25, %v2519_v24  ;;  %v1840_v33 = vsub.f32 0.0, %v2521_v26 }
 0x762   : > { %v1832_v29 = vsel %vm1830_vm4, %v2517_v23, %v1831_v27  ;;  %v1939_v30 = vsel %vm1937_vm5, %v2517_v23, %v1831_v27 }
 0x763   : > { %v1836_v31 = vsel %vm1829_vm7, %v1832_v29, %v1835_v60  ;;  %v1943_v34 = vsel %vm1936_vm8, %v1939_v30, %v1942_v28 }
 0x764   : > { %v1837_v63 = vsel %vm1827_vm9, nan, %v1836_v31  ;;  %v1944_v35 = vsel %vm1827_vm9, nan, %v1943_v34 }
 0x765   : > { %v1838_v38 = vmul.f32 %v2521_v26, %v1837_v63  ;;  %v1945_v20 = vmul.f32 %v1944_v35, %v1840_v33 }
 0x767   : > { %v1839_v36 = vadd.f32 1.0, %v1838_v38  ;;  %v1947_v40 = vmul.f32 %v1945_v20, %v1945_v20  ;;  %v1956_v45 = vmul.f32 %v1945_v20, %v3040_v55  ;;  %v1952_v46 = vmul.f32 %v1945_v20, %v3042_v56 }
 0x769   : > { %v1946_v39 = vmul.f32 %v1839_v36, %v1839_v36  ;;  %v1951_v42 = vmul.f32 %v1839_v36, %v3040_v55  ;;  %v1955_v0 = vmul.f32 %v1839_v36, %v3042_v56 }
 0x76b   : > { %v1948_v41 = vadd.f32 %v1947_v40, %v1946_v39  ;;  %v1957_v48 = vsub.f32 %v1955_v0, %v1956_v45  ;;  %v1953_v49 = vadd.f32 %v1952_v46, %v1951_v42 }
 0x76d   : > { %2522 = vrcp.f32 %v1948_v41 }
 0x77a   : > { %v2523_v37 = vpop.eup %2522 }
 0x77b   : > { %v1958_v50 = vmul.f32 %v2523_v37, %v1957_v48  ;;  %v1954_v51 = vmul.f32 %v2523_v37, %v1953_v49 }
 0x77d   : > { %2398 = vmatpush3.msra.mxu1 %v1958_v50  ;;  %2403 = vmatpush3.msra.mxu0 %v1954_v51 }
 0x77e   : > { %2400 = vmatmul.mubr.msk.f32.vlgmr.msra.gmra.mxu1 %vm1132_vm6, %v3027_v44  ;;  %2405 = vmatmul.mubr.msk.f32.vlgmr.msra.gmra.mxu0 %vm1132_vm6, %v3017_v43 }
 0x83e   : > { %v2025_v52 = vpop.f32.mrf.mxu1  ;;  %v2095_v55 = vpop.f32.mrf.mxu0 }
 0x83f   : > { %v2096_v56 = vadd.f32 %v2095_v55, %v2025_v52 }
 0x840   : > { %v2401_v53 = vpop.f32.mrf.mxu1  ;;  %v2406_v54 = vpop.f32.mrf.mxu0 }
 0x841   : > { %v2099_v9 = vmul.f32 0.125, %v2096_v56 }
 0x843   : > { %v2100_v57 = vadd.f32 %v2099_v9, %v3008_v32 }
 0x845   : > { %2101 = vst.msk [vmem:[%s539_s21] sm:$0xff] %vm545_vm0, %v2100_v57 }
 0x846   : > { %2537 = shalt.err (!%p2534_p3)
}
 0x847   : > { %s2538_s20 = scalar_lea.hbm %s2114_s29, 128  ;;  %s2542_s21 = scalar_lea.hbm %s3125_s17, 256 }
 0x848   : > { %p2539_p4 = scmp.ne.s32.totalorder %s2114_s29, %s2538_s20  ;;  %p2543_p9 = scmp.lt.s32.totalorder %s2114_s29, %s3125_s17 }
 0x849   : > { %p2544_p10 = scmp.lt.s32.totalorder %s2542_s21, %s2538_s20 }
 0x84a   : > { %p2540_p7 = pnand %p2539_p4, %p2731_p5 }
 0x84b   : > { %p2545_p11 = por %p2544_p10, %p2543_p9 }
 0x84c   : > { %p2541_p8 = pneg %p2540_p7 }
 0x84e   : > { %p2546_p12 = pnand %p2545_p11, %p2541_p8 }
 0x850   : > { %2549 = shalt.err (!%p2546_p12)
}
 0x851   : > { %2411 = dma.vmem_to_hbm [thread:$0]  (%p2731_p5), %s2117_s23, 128, %s2114_s29, %s2103_s30  }
 0x852 PF: > { %p2417_p13 = scmp.ge.s32.totalorder %s2584_s27, 2  ;;  %s2128_s0 = sand.u32 1, %s2572_s24  }
 0x853   : > { %s2129_s28 = scalar_lea.sflag [#allocation9], %s2128_s0 }
 0x854   : > { %p2414_p0 = pnand %p2417_p13, %p2735_p6 }
 0x856   : > { %p2415_p1 = pneg %p2414_p0 }
 0x858   : > { %2567 = dma.done.wait (%p2415_p1), %s2129_s28, 128  }
 0x859   : > { %2569 = vsyncadd (%p2415_p1), %s2129_s28, 4294967168  ;;  %s3148_s27 = sld [smem:[#allocation12_spill]]  ;;  %s3151_s24 = smov %s2576_s25 }
 0x85a   : > { %s3149_s3 = sld [smem:[#allocation11_spill]] }
 0x85b   : > { %s3150_s26 = sld [smem:[#allocation13_spill]] }
 0x85f   : > { %p27_p2 = scmp.ge.s32.totalorder %s3148_s27, 4  }
 0x860   : > { %s3152_s25 = smov %s3149_s3 }
 0x861   :  { %29 = sbr.rel (!%p27_p2) target bundleno = 8 (0x8), region = 123 }
 0x866   :  { %2134 = vsyncpa [#allocation9], 1 }
 0x867   :  { %2136 = vsyncpa [#allocation9 + $0x1], 1 }

</bundles_post_ra>
